<compile_context>
chip_gen: v7x
topology: tpu7x:2x2x1
jax: 0.10.0
libtpu: 0.0.40
codegen_flags: <defaults>
</compile_context>

<pallas_src>
import functools
import math

import jax
import jax.numpy as jnp
from jax import lax
from jax.experimental import pallas as pl
from jax.experimental.pallas import tpu as pltpu


# ------------------------------ tiling helpers ------------------------------
def _pick_tile(full, pref, align):
    """Largest multiple of `align` <= min(pref, full) that divides `full`;
    falls back to `full` itself (a block equal to the array dim is always legal)."""
    t = (min(pref, full) // align) * align
    while t >= align:
        if full % t == 0:
            return t
        t -= align
    return full


def _head_group(num_heads, head_dim):
    """Smallest number of heads per block whose combined lane width is a
    multiple of 128 (lane-dense loads/stores)."""
    for g in range(1, num_heads + 1):
        if num_heads % g == 0 and (g * head_dim) % 128 == 0:
            return g
    return num_heads


# ------------------------- tiled Linear: x @ W + b --------------------------
def _linear_kernel(x_ref, w_ref, b_ref, o_ref, acc_ref):
    k_idx = pl.program_id(2)

    @pl.when(k_idx == 0)
    def _():
        # Seed the accumulator with the bias: saves a separate finalize add.
        acc_ref[...] = jnp.broadcast_to(
            b_ref[...].astype(jnp.float32), acc_ref.shape)

    acc_ref[...] += jnp.dot(x_ref[...], w_ref[...],
                            preferred_element_type=jnp.float32)

    @pl.when(k_idx == pl.num_programs(2) - 1)
    def _():
        o_ref[...] = acc_ref[...].astype(o_ref.dtype)


def linear(x2d, w, b, *, tm_pref=256, tn_pref=512, tk_pref=512):
    """x2d: (M, K), w: (K, N), b: (N,) -> (M, N), tiled matmul + bias."""
    M, K = x2d.shape
    K2, N = w.shape
    assert K == K2
    tm = _pick_tile(M, tm_pref, 8)
    tn = _pick_tile(N, tn_pref, 128)
    tk = _pick_tile(K, tk_pref, 128)
    b2 = b.reshape(1, N)
    return pl.pallas_call(
        _linear_kernel,
        out_shape=jax.ShapeDtypeStruct((M, N), x2d.dtype),
        grid=(M // tm, N // tn, K // tk),
        in_specs=[
            pl.BlockSpec((tm, tk), lambda i, j, k: (i, k)),
            pl.BlockSpec((tk, tn), lambda i, j, k: (k, j)),
            pl.BlockSpec((1, tn), lambda i, j, k: (0, j)),
        ],
        out_specs=pl.BlockSpec((tm, tn), lambda i, j, k: (i, j)),
        scratch_shapes=[pltpu.VMEM((tm, tn), jnp.float32)],
        compiler_params=pltpu.CompilerParams(
            dimension_semantics=("parallel", "parallel", "arbitrary"),
            vmem_limit_bytes=32 * 1024 * 1024,
        ),
    )(x2d, w, b2)


# ------------------ flash attention reading the packed qkv ------------------
def _flash_attn_kernel(q_ref, k_ref, v_ref, o_ref, m_sc, l_sc, acc_sc, *,
                       heads_per_block, head_dim, scale):
    kv_idx = pl.program_id(3)

    @pl.when(kv_idx == 0)
    def _():
        m_sc[...] = jnp.full(m_sc.shape, -jnp.inf, m_sc.dtype)
        l_sc[...] = jnp.zeros(l_sc.shape, l_sc.dtype)
        acc_sc[...] = jnp.zeros(acc_sc.shape, acc_sc.dtype)

    # Scale folded into q: tq*Dh multiplies instead of tq*tk on the score matrix.
    q = q_ref[0] * scale          # (tq, hg*dh), native dtype (bf16 stays bf16)
    k = k_ref[0]                  # (tk, hg*dh)
    v = v_ref[0]                  # (tk, hg*dh)

    for h in range(heads_per_block):
        sl = slice(h * head_dim, (h + 1) * head_dim)
        qh, kh, vh = q[:, sl], k[:, sl], v[:, sl]

        # QK^T: contract the Dh axis of both operands directly (no k.T copy).
        s = lax.dot_general(qh, kh, (((1,), (1,)), ((), ())),
                            preferred_element_type=jnp.float32)      # (tq, tk)

        m_prev = m_sc[h]                                             # (tq, 1)
        m_new = jnp.maximum(m_prev, s.max(axis=-1, keepdims=True))
        alpha = jnp.exp(m_prev - m_new)
        p = jnp.exp(s - m_new)                                       # f32 stats
        l_sc[h] = alpha * l_sc[h] + p.sum(axis=-1, keepdims=True)
        acc_sc[h] = alpha * acc_sc[h] + jnp.dot(
            p.astype(vh.dtype), vh, preferred_element_type=jnp.float32)
        m_sc[h] = m_new

    @pl.when(kv_idx == pl.num_programs(3) - 1)
    def _():
        parts = []
        for h in range(heads_per_block):
            inv = pl.reciprocal(l_sc[h], approx=True)   # EUP slot, not a divide
            parts.append(acc_sc[h] * inv)               # (tq, dh) f32
        o = parts[0] if len(parts) == 1 else jnp.concatenate(parts, axis=-1)
        o_ref[0] = o.astype(o_ref.dtype)                # lane-dense store


def attention_from_qkv(qkv, num_heads, head_dim, *, tq_pref=256, tk_pref=512):
    """qkv: (B, S, 3*dim) packed [q|k|v] -> (B, S, dim) attention output.

    Q/K/V head-groups are sliced out of the packed buffer by the BlockSpec
    index_maps, so no split/transpose HBM round-trips are needed, and the
    output is written directly in the (B, S, dim) layout the proj expects.
    """
    B, S, three_dim = qkv.shape
    dim = num_heads * head_dim
    assert three_dim == 3 * dim

    hg = _head_group(num_heads, head_dim)
    lane_block = hg * head_dim
    if lane_block % 128 != 0:
        # TODO(synk): head_dim/num_heads combos that cannot form a 128-lane
        # head-group would need full-width qkv blocks; not needed for dim=512/H=8.
        raise NotImplementedError("head_dim * head_group must be a multiple of 128")
    G = dim // lane_block                      # number of head-groups

    tq = _pick_tile(S, tq_pref, 8)
    tk = _pick_tile(S, tk_pref, 8)
    scale = 1.0 / math.sqrt(head_dim)

    kernel = functools.partial(_flash_attn_kernel, heads_per_block=hg,
                               head_dim=head_dim, scale=scale)
    return pl.pallas_call(
        kernel,
        out_shape=jax.ShapeDtypeStruct((B, S, dim), qkv.dtype),
        grid=(B, G, S // tq, S // tk),
        in_specs=[
            # q group g lives at block column g of the packed qkv buffer,
            # k at G + g, v at 2*G + g (block width = lane_block).
            pl.BlockSpec((1, tq, lane_block), lambda b, g, qi, ki: (b, qi, g)),
            pl.BlockSpec((1, tk, lane_block), lambda b, g, qi, ki: (b, ki, G + g)),
            pl.BlockSpec((1, tk, lane_block), lambda b, g, qi, ki: (b, ki, 2 * G + g)),
        ],
        out_specs=pl.BlockSpec((1, tq, lane_block), lambda b, g, qi, ki: (b, qi, g)),
        scratch_shapes=[
            pltpu.VMEM((hg, tq, 1), jnp.float32),          # running max m
            pltpu.VMEM((hg, tq, 1), jnp.float32),          # running sum l
            pltpu.VMEM((hg, tq, head_dim), jnp.float32),   # output accumulator
        ],
        compiler_params=pltpu.CompilerParams(
            dimension_semantics=("parallel", "parallel", "parallel", "arbitrary"),
            vmem_limit_bytes=32 * 1024 * 1024,
        ),
    )(qkv, qkv, qkv)


# ----------------------------- full block forward ----------------------------
def xformers_attention_block(x_in, params, num_heads):
    """Matches XFormersAttentionBlock.forward with format='bshd', attn_bias=None."""
    # TODO(synk): attn_bias is not supported (module default is None).
    B, S, dim = x_in.shape
    head_dim = dim // num_heads

    qkv = linear(x_in.reshape(B * S, dim), params["wqkv"], params["bqkv"])
    qkv = qkv.reshape(B, S, 3 * dim)                      # free view, no HBM shuffle

    o = attention_from_qkv(qkv, num_heads, head_dim)      # (B, S, dim)

    out = linear(o.reshape(B * S, dim), params["wproj"], params["bproj"])
    return out.reshape(B, S, dim)


# ----------------------------- pure-JAX reference -----------------------------
def _ref_forward(x_in, params, num_heads):
    B, S, dim = x_in.shape
    Dh = dim // num_heads
    qkv = x_in @ params["wqkv"] + params["bqkv"]
    q, k, v = jnp.split(qkv, 3, axis=-1)
    q = q.reshape(B, S, num_heads, Dh)
    k = k.reshape(B, S, num_heads, Dh)
    v = v.reshape(B, S, num_heads, Dh)
    s = jnp.einsum("bqhd,bkhd->bhqk", q, k) / math.sqrt(Dh)
    p = jax.nn.softmax(s, axis=-1)
    o = jnp.einsum("bhqk,bkhd->bqhd", p, v).reshape(B, S, dim)
    return o @ params["wproj"] + params["bproj"]


if __name__ == "__main__":
    # Module config: dim=512, num_heads=8 (head_dim=64); small B/S for the test.
    B, S, dim, num_heads = 2, 256, 512, 8

    key = jax.random.PRNGKey(0)
    kx, k1, k2, k3, k4 = jax.random.split(key, 5)
    x = jax.random.normal(kx, (B, S, dim), dtype=jnp.float32)

    # Deterministic parameter init (nn.Linear(dim, 3*dim) / nn.Linear(dim, dim),
    # stored as (in, out), i.e. transposed vs. PyTorch).
    bound = 1.0 / math.sqrt(dim)
    params = {
        "wqkv": jax.random.uniform(k1, (dim, 3 * dim), jnp.float32, -bound, bound),
        "bqkv": jax.random.uniform(k2, (3 * dim,), jnp.float32, -bound, bound),
        "wproj": jax.random.uniform(k3, (dim, dim), jnp.float32, -bound, bound),
        "bproj": jax.random.uniform(k4, (dim,), jnp.float32, -bound, bound),
    }

    out = xformers_attention_block(x, params, num_heads)
    out = jax.block_until_ready(out)

    ref = _ref_forward(x, params, num_heads)
    assert out.shape == (B, S, dim)
    max_err = float(jnp.max(jnp.abs(out - ref)))
    assert jnp.allclose(out, ref, atol=5e-3, rtol=5e-3), (
        f"mismatch vs reference (max abs err {max_err})")

    print("KERNEL_OK")
</pallas_src>

<mosaic_0001>
module attributes {stable_mosaic.version = 11 : i64} {
  func.func @_linear_kernel(%arg0: i32, %arg1: i32, %arg2: i32, %arg3: memref<256x512xf32, #tpu.memory_space<vmem>>, %arg4: memref<512x512xf32, #tpu.memory_space<vmem>>, %arg5: memref<1x512xf32, #tpu.memory_space<vmem>>, %arg6: memref<256x512xf32, #tpu.memory_space<vmem>>, %arg7: memref<256x512xf32, #tpu.memory_space<vmem>>) attributes {dimension_semantics = [#tpu.dimension_semantics<parallel>, #tpu.dimension_semantics<parallel>, #tpu.dimension_semantics<arbitrary>], iteration_bounds = array<i64: 2, 3, 1>, scalar_prefetch = 0 : i64, scratch_operands = 1 : i64, tpu.core_type = #tpu.core_type<tc>, window_params = [{transform_indices = @transform_0, window_bounds = array<i64: 256, 512>}, {transform_indices = @transform_1, window_bounds = array<i64: 512, 512>}, {transform_indices = @transform_2, window_bounds = array<i64: 1, 512>}, {transform_indices = @transform_3, window_bounds = array<i64: 256, 512>}]} {
    %c0_i32 = arith.constant 0 : i32
    %0 = arith.cmpi eq, %arg2, %c0_i32 : i32
    %1 = arith.extui %0 : i1 to i32
    %c0_i32_0 = arith.constant 0 : i32
    %2 = arith.cmpi ne, %1, %c0_i32_0 : i32
    scf.if %2 {
      %c0_10 = arith.constant 0 : index
      %c0_11 = arith.constant 0 : index
      %12 = vector.load %arg5[%c0_10, %c0_11] : memref<1x512xf32, #tpu.memory_space<vmem>>, vector<1x512xf32>
      %13 = vector.shape_cast %12 : vector<1x512xf32> to vector<1x512xf32>
      %14 = vector.broadcast %13 : vector<1x512xf32> to vector<256x512xf32>
      %c0_12 = arith.constant 0 : index
      %c0_13 = arith.constant 0 : index
      %15 = vector.load %arg7[%c0_12, %c0_13] : memref<256x512xf32, #tpu.memory_space<vmem>>, vector<256x512xf32>
      tpu.vector_store %arg7[%c0_12, %c0_13], %14 {strides = array<i32>} : memref<256x512xf32, #tpu.memory_space<vmem>>, vector<256x512xf32>,
    } else {
    }
    %c0 = arith.constant 0 : index
    %c0_1 = arith.constant 0 : index
    %3 = vector.load %arg7[%c0, %c0_1] : memref<256x512xf32, #tpu.memory_space<vmem>>, vector<256x512xf32>
    %c0_2 = arith.constant 0 : index
    %c0_3 = arith.constant 0 : index
    %4 = vector.load %arg3[%c0_2, %c0_3] : memref<256x512xf32, #tpu.memory_space<vmem>>, vector<256x512xf32>
    %c0_4 = arith.constant 0 : index
    %c0_5 = arith.constant 0 : index
    %5 = vector.load %arg4[%c0_4, %c0_5] : memref<512x512xf32, #tpu.memory_space<vmem>>, vector<512x512xf32>
    %cst = arith.constant dense<0.000000e+00> : vector<256x512xf32>
    %6 = tpu.matmul %4, %5, %cst {dimension_numbers = #tpu.dot_dimension_numbers<[1], [0], [0], [1], [0, 0, 1, 1], [], []>} : vector<256x512xf32>, vector<512x512xf32>, vector<256x512xf32> -> vector<256x512xf32>
    %7 = arith.addf %3, %6 : vector<256x512xf32>
    %c0_6 = arith.constant 0 : index
    %c0_7 = arith.constant 0 : index
    %8 = vector.load %arg7[%c0_6, %c0_7] : memref<256x512xf32, #tpu.memory_space<vmem>>, vector<256x512xf32>
    tpu.vector_store %arg7[%c0_6, %c0_7], %7 {strides = array<i32>} : memref<256x512xf32, #tpu.memory_space<vmem>>, vector<256x512xf32>,
    %c0_i32_8 = arith.constant 0 : i32
    %9 = arith.cmpi eq, %arg2, %c0_i32_8 : i32
    %10 = arith.extui %9 : i1 to i32
    %c0_i32_9 = arith.constant 0 : i32
    %11 = arith.cmpi ne, %10, %c0_i32_9 : i32
    scf.if %11 {
      %c0_10 = arith.constant 0 : index
      %c0_11 = arith.constant 0 : index
      %12 = vector.load %arg7[%c0_10, %c0_11] : memref<256x512xf32, #tpu.memory_space<vmem>>, vector<256x512xf32>
      %c0_12 = arith.constant 0 : index
      %c0_13 = arith.constant 0 : index
      %13 = vector.load %arg6[%c0_12, %c0_13] : memref<256x512xf32, #tpu.memory_space<vmem>>, vector<256x512xf32>
      tpu.vector_store %arg6[%c0_12, %c0_13], %12 {strides = array<i32>} : memref<256x512xf32, #tpu.memory_space<vmem>>, vector<256x512xf32>,
    } else {
    }
    return
  }
  func.func @transform_0(%arg0: i32, %arg1: i32, %arg2: i32) -> (i32, i32) {
    %c0_i32 = arith.constant 0 : i32
    return %arg0, %arg2 : i32, i32
  }
  func.func @transform_1(%arg0: i32, %arg1: i32, %arg2: i32) -> (i32, i32) {
    %c0_i32 = arith.constant 0 : i32
    return %arg2, %arg1 : i32, i32
  }
  func.func @transform_2(%arg0: i32, %arg1: i32, %arg2: i32) -> (i32, i32) {
    %c0_i32 = arith.constant 0 : i32
    %c0_i32_0 = arith.constant 0 : i32
    return %c0_i32, %arg1 : i32, i32
  }
  func.func @transform_3(%arg0: i32, %arg1: i32, %arg2: i32) -> (i32, i32) {
    %c0_i32 = arith.constant 0 : i32
    return %arg0, %arg1 : i32, i32
  }
}

</mosaic_0001>

<bundles_post_ra>
// kernel: tpu_custom_call.1
= control target key start
LH: loop header
LB: loop body
LE: loop exit
PB: predicated region body
PF: predicated region fallthrough
CT: control target
= control target key end

     0   :  { %s4547_s0 = inlined_call_operand.hbm [shape: f32[512,512], index: 0, kind: input, shape index: {}]   ;;  %s4548_s1 = inlined_call_operand.hbm [shape: f32[512,1536], index: 1, kind: input, shape index: {}]   ;;  %s4549_s2 = inlined_call_operand.hbm [shape: f32[1,1536], index: 2, kind: input, shape index: {}]   ;;  %s4550_s3 = inlined_call_operand.hbm [shape: f32[512,1536], index: 3, kind: output, shape index: {}]  }
   0x1   :  { %4568 = sst [smem:[#allocation25_spill]] %s4548_s1 }
   0x2   :  { %4569 = sst [smem:[#allocation26_spill]] %s4550_s3 }
   0x3   :  { %8 = vsyncpa [#allocation4], 0 }
   0x4   :  { %10 = vsyncpa [#allocation4 + $0x1], 0 }
   0x5   :  { %11 = vsyncpa [#allocation7], 0 }
   0x6   :  { %13 = vsyncpa [#allocation7 + $0x1], 0 }
   0x7   :  { %14 = vsyncpa [#allocation5], 0 }
   0x8   :  { %16 = vsyncpa [#allocation5 + $0x1], 0  ;;  %s3496_s12 = smov 0   ;;  %s3498_s13 = smov 0  }
   0x9   :  { %s3500_s14 = smov 0   ;;  %s3502_s15 = smov 0  }
   0xa   :  { %s3504_s16 = smov 0   ;;  %s3506_s17 = smov 0  }
   0xb   :  { %s3508_s18 = smov 0   ;;  %s3510_s19 = smov 0  }
   0xc   :  { %s3512_s20 = smov 0   ;;  %s3514_s21 = smov 0  }
   0xd   :  { %s3516_s22 = smov 0   ;;  %s3518_s23 = smov 0  }
   0xe   :  { %s3520_s24 = smov 0   ;;  %s3522_s25 = smov 0  }
   0xf LB: > { %4570 = sst [smem:[#allocation13_spill]] %s3420_s14  ;;  %s37_s26 = sadd.s32 1, %s3456_s23  ;;  %s3464_s25 = sphi %s3522_s25, %s22_s25   ;;  %s3460_s24 = sphi %s3520_s24, %s4621_s24   ;;  %s3456_s23 = sphi %s3518_s23, %s4629_s23   ;;  %s3452_s22 = sphi %s3516_s22, %s4619_s22   ;;  %s3448_s21 = sphi %s3514_s21, %s4628_s21   ;;  %s3444_s20 = sphi %s3512_s20, %s4617_s20   ;;  %s3440_s19 = sphi %s3510_s19, %s4627_s19   ;;  %s3436_s18 = sphi %s3508_s18, %s4626_s18   ;;  %s3432_s17 = sphi %s3506_s17, %s4615_s17   ;;  %s3428_s16 = sphi %s3504_s16, %s4625_s16   ;;  %s3424_s15 = sphi %s3502_s15, %s4624_s15   ;;  %s3420_s14 = sphi %s3500_s14, %s4613_s14   ;;  %s3416_s13 = sphi %s3498_s13, %s4623_s13   ;;  %s3412_s12 = sphi %s3496_s12, %s4622_s12  }
  0x10   : > { %4571 = sst [smem:[#allocation14_spill]] %s3432_s17  ;;  %p4553_p0 = scmp.eq.s32.totalorder %s3464_s25, 0 }
  0x11   : > { %4572 = sst [smem:[#allocation15_spill]] %s3444_s20  ;;  %p3570_p1 = scmp.ge.s32.totalorder %s37_s26, 3 }
  0x12   : > { %4573 = sst [smem:[#allocation16_spill]] %s3448_s21  ;;  %p85_p2 = scmp.ne.s32.totalorder %s3432_s17, %s3428_s16 }
  0x13   : > { %4574 = sst [smem:[#allocation17_spill]] %s3452_s22  ;;  %p4552_p4 = scmp.lt.s32.totalorder %s3464_s25, 6 }
  0x14   : > { %4575 = sst [smem:[#allocation18_spill]] %s3456_s23  ;;  %p87_p5 = por %p85_p2, %p4553_p0 }
  0x15   : > { %4576 = sst [smem:[#allocation19_spill]] %s3460_s24  ;;  %s193_s29 = sand.u32 1, %s3464_s25  }
  0x16   : > { %s4551_s30 = sand.u32 1, %s3432_s17   ;;  %s2695_s5 = sshll.u32 %s3456_s23, 9 }
  0x17   : > { %s2675_s4 = sshll.u32 %s4551_s30, 11  ;;  %s4578_s1 = sld [smem:[#allocation25_spill]] }
  0x18   : > { %s197_s9 = scalar_lea.vmem [#allocation6], %s2675_s4  ;;  %p3594_p6 = pnand %p4552_p4, %p87_p5 }
  0x19   : > { %s207_s10 = sshll.u32 %s197_s9, 4  ;;  %s3601_s30 = scalar_lea.sflag [#allocation7], %s193_s29  ;;  %s3598_s10 = int_to_ptr.vmem [resolvable:$true] %s207_s10 }
  0x1a   : > { %p4564_p9 = pneg %p3594_p6 }
  0x1d   : > { %s3590_s8 = scalar_lea.hbm %s4578_s1, %s2695_s5  ;;  %s3229_s7 = scalar_lea.hbm %s4578_s1, 98304 }
  0x1e   : > { %s3224_s5 = scalar_lea.hbm %s3590_s8, 32768  ;;  %p3230_p12 = scmp.lt.u32.totalorder %s3590_s8, %s4578_s1 }
  0x1f   : > { %p3225_p8 = scmp.ne.s32.totalorder %s3590_s8, %s3224_s5  ;;  %p3231_p13 = scmp.lt.u32.totalorder %s3229_s7, %s3224_s5 }
  0x20   : > { %p3233_p5 = scmp.lt.u32.totalorder %s3224_s5, %s3590_s8 }
  0x21   : > { %p3227_p10 = pnand %p4564_p9, %p3225_p8  ;;  %p3232_p2 = por %p3231_p13, %p3230_p12 }
  0x23   : > { %p3228_p11 = pneg %p3227_p10  ;;  %p3234_p4 = por %p3233_p5, %p3232_p2 }
  0x25   : > { %p3235_p3 = pnand %p3234_p4, %p3228_p11 }
  0x27   : > { %3238 = shalt.err (!%p3235_p3)
}
  0x28   : > { %s3239_s29 = scalar_lea.vmem %s3598_s10, 32768  ;;  %s3466_s4 = smov [#allocation6]  }
  0x29   : > { %p3240_p8 = scmp.ne.s32.totalorder %s3598_s10, %s3239_s29  ;;  %s3244_s6 = sshll.u32 %s3466_s4, 4  ;;  %s3245_s6 = int_to_ptr.vmem [resolvable:$false] %s3244_s6 }
  0x2a   : > { %s3246_s28 = scalar_lea.vmem %s3245_s6, 65536  ;;  %p3247_p7 = scmp.lt.s32.totalorder %s3598_s10, %s3245_s6 }
  0x2b   : > { %p3242_p10 = pnand %p3240_p8, %p4564_p9  ;;  %p3248_p12 = scmp.lt.s32.totalorder %s3246_s28, %s3239_s29 }
  0x2d   : > { %p3243_p0 = pneg %p3242_p10  ;;  %p3249_p13 = por %p3248_p12, %p3247_p7 }
  0x2f   : > { %p3250_p2 = pnand %p3249_p13, %p3243_p0 }
  0x31   : > { %3253 = shalt.err (!%p3250_p2)
}
  0x32   : > { %s3467_s5 = smov 1536   ;;  %s4554_s7 = smov 512  }
  0x33   : > { %s4555_s9 = smov 32   ;;  %p234_p0 = scmp.lt.s32.totalorder %s3464_s25, 7 }
  0x34   : > { %3096 = dma.hbm_to_vmem [thread:$0]  (!%p3594_p6), %s3590_s8, 32768, %s3598_s10, %s3601_s30, %s3467_s5, %s4554_s7, %s4555_s9  }
  0x35   : > { %p4580_p3 = scmp.ge.s32.totalorder %s3464_s25, 1  ;;  %s3639_s4 = sadd.s32 4294967295, %s3464_s25  }
  0x36   : > { %s2668_s6 = sadd.s32 4294967294, %s3464_s25   ;;  %s4631_s26 = smov (%p3570_p1, %s37_s26), 0 }
  0x37   : > { %p3634_p4 = pnand %p4580_p3, %p234_p0  ;;  %4582 = sst [smem:[#allocation20_spill]] %s4631_s26 }
  0x38   : > { %s41_s28 = sadd.s32 1, %s3460_s24  ;;  %s50_s8 = sadd.s32 1, %s3444_s20 }
  0x39   : > { %s4581_s29 = scalar_select %p3634_p4, 1, 0 }
  0x3a   : > { %s4633_s28 = smov (!%p3570_p1, %s41_s28), %s3460_s24  ;;  %p57_p7 = scmp.ne.s32.totalorder %s3444_s20, %s3440_s19 }
  0x3b   : > { %p63_p11 = scmp.ne.s32.totalorder %s3440_s19, %s3436_s18  ;;  %p43_p5 = scmp.ge.s32.totalorder %s4633_s28, 2 }
  0x3c   : > { %p64_p8 = scmp.eq.s32.totalorder %s3639_s4, 0  ;;  %p4583_p10 = scmp.eq.s32.totalorder %s3464_s25, 0 }
  0x3d   : > { %s74_s5 = ssub.s32 %s3456_s23, %s4631_s26  ;;  %s4635_s28 = smov (%p43_p5, %s4633_s28), 0 }
  0x3e   : > { %p3660_p12 = por %p4583_p10, %p57_p7  ;;  %4585 = sst [smem:[#allocation21_spill]] %s4635_s28 }
  0x3f   : > { %p3668_p1 = por %p64_p8, %p63_p11  ;;  %p76_p13 = scmp.eq.s32.totalorder %s74_s5, 0 }
  0x40   : > { %s45_s18 = ssub.s32 %s3460_s24, %s4635_s28  ;;  %p4587_p2 = scmp.ne.s32.totalorder %s3428_s16, %s3424_s15 }
  0x41   : > { %s4586_s27 = scalar_select %p3668_p1, 1, 0 }
  0x42   : > { %p3677_p0 = por %p4587_p2, %p64_p8  ;;  %p48_p3 = scmp.eq.s32.totalorder %s45_s18, 0 }
  0x43   : > { %s129_s9 = sor.u32 %s74_s5, %s45_s18  ;;  %s4589_s1 = sadd.s32 1, %s3432_s17 }
  0x44   : > { %s4588_s7 = scalar_select %p3677_p0, 1, 0 }
  0x45   : > { %s3684_s26 = scalar_select %p76_p13, %s3432_s17, %s4589_s1  }
  0x46   : > { %s3687_s3 = scalar_select %p48_p3, %s3444_s20, %s50_s8  }
  0x47   : > { %4590 = sst [smem:[#allocation22_spill]] %s3684_s26  ;;  %p130_p7 = scmp.eq.s32.totalorder %s129_s9, 0 }
  0x48   : > { %4591 = sst [smem:[#allocation23_spill]] %s3687_s3  ;;  %s132_s21 = sadd.s32 1, %s3420_s14 }
  0x49   : > { %p142_p11 = scmp.ne.s32.totalorder %s3420_s14, %s3416_s13  ;;  %p143_p5 = scmp.eq.s32.totalorder %s3639_s4, 5 }
  0x4a   : > { %s3694_s15 = scalar_select %p130_p7, %s3420_s14, %s132_s21  }
  0x4b   : > { %p3696_p8 = por %p143_p5, %p142_p11  ;;  %p148_p10 = scmp.ne.s32.totalorder %s3416_s13, %s3412_s12 }
  0x4c   : > { %4592 = sst [smem:[#allocation24_spill]] %s3694_s15  ;;  %p149_p2 = scmp.eq.s32.totalorder %s2668_s6, 5 }
  0x4d   : > { %s4593_s28 = scalar_select %p3696_p8, 1, 0 }
  0x4e   : > { %s169_s1 = sand.u32 1, %s3444_s20   ;;  %p3703_p13 = por %p149_p2, %p148_p10 }
  0x4f   : > { %s2671_s5 = sshll.u32 %s169_s1, 10  ;;  %s2694_s9 = sshll.u32 %s3460_s24, 14 }
  0x50   : > { %s4594_s8 = scalar_select %p3703_p13, 1, 0 }
  0x51   : > { %s173_s18 = scalar_lea.vmem [#allocation3], %s2671_s5  ;;  %s3711_s21 = scalar_lea.hbm %s4547_s0, %s2694_s9 }
  0x52   : > { %s183_s3 = sshll.u32 %s173_s18, 4  ;;  %p4595_p3 = scmp.lt.s32.totalorder %s3464_s25, 6  ;;  %s3713_s3 = int_to_ptr.vmem [resolvable:$true] %s183_s3 }
  0x53   : > { %s4597_s24 = sand.u32 1, %s3432_s17   ;;  %s2696_s22 = sshll.u32 %s3456_s23, 6 }
  0x54   : > { %p3719_p7 = pnand %p4595_p3, %p3660_p12  ;;  %s3725_s5 = sshll.u32 %s4597_s24, 2 }
  0x55   : > { %s3731_s18 = scalar_lea.hbm %s4549_s2, %s2696_s22  ;;  %s3733_s20 = scalar_lea.sflag [#allocation4], %s169_s1 }
  0x56   : > { %s3254_s15 = scalar_lea.hbm %s3711_s21, 16384  ;;  %p3256_p12 = pneg %p3719_p7 }
  0x57   : > { %p3255_p11 = scmp.ne.s32.totalorder %s3711_s21, %s3254_s15  ;;  %s3259_s24 = scalar_lea.hbm %s4547_s0, 32768 }
  0x58   : > { %p3260_p2 = scmp.lt.u32.totalorder %s3711_s21, %s4547_s0  ;;  %p3261_p3 = scmp.lt.u32.totalorder %s3259_s24, %s3254_s15 }
  0x59   : > { %p3257_p5 = pnand %p3256_p12, %p3255_p11  ;;  %p3263_p13 = scmp.lt.u32.totalorder %s3254_s15, %s3711_s21 }
  0x5a   : > { %p3262_p9 = por %p3261_p3, %p3260_p2 }
  0x5b   : > { %p3258_p10 = pneg %p3257_p5 }
  0x5c   : > { %p3264_p8 = por %p3263_p13, %p3262_p9 }
  0x5e   : > { %p3265_p0 = pnand %p3264_p8, %p3258_p10 }
  0x60   : > { %3268 = shalt.err (!%p3265_p0)
}
  0x61   : > { %s3269_s1 = scalar_lea.vmem %s3713_s3, 16384  ;;  %s3470_s17 = smov [#allocation3]  }
  0x62   : > { %p3270_p11 = scmp.ne.s32.totalorder %s3713_s3, %s3269_s1  ;;  %s3274_s22 = sshll.u32 %s3470_s17, 4  ;;  %s3275_s22 = int_to_ptr.vmem [resolvable:$false] %s3274_s22 }
  0x63   : > { %s3276_s14 = scalar_lea.vmem %s3275_s22, 32768  ;;  %p3277_p4 = scmp.lt.s32.totalorder %s3713_s3, %s3275_s22 }
  0x64   : > { %p3272_p5 = pnand %p3270_p11, %p3256_p12  ;;  %p3278_p2 = scmp.lt.s32.totalorder %s3276_s14, %s3269_s1 }
  0x66   : > { %p3273_p1 = pneg %p3272_p5  ;;  %p3279_p3 = por %p3278_p2, %p3277_p4 }
  0x68   : > { %p3280_p9 = pnand %p3279_p3, %p3273_p1 }
  0x6a   : > { %3283 = shalt.err (!%p3280_p9)
}
  0x6b   : > { %s4598_s23 = smov 32   ;;  %s4599_s15 = smov 512  }
  0x6c   : > { %3093 = dma.hbm_to_vmem [thread:$0]  (!%p3719_p7), %s3711_s21, 16384, %s3713_s3, %s3733_s20, %s4599_s15, %s4599_s15, %s4598_s23  }
  0x6d   : > { %s221_s26 = scalar_lea.vmem [#allocation8], %s3725_s5  ;;  %s3284_s10 = scalar_lea.hbm %s3731_s18, 64 }
  0x6e   : > { %s229_s9 = sshll.u32 %s221_s26, 4  ;;  %p3285_p4 = scmp.ne.s32.totalorder %s3731_s18, %s3284_s10  ;;  %s230_s9 = int_to_ptr.vmem [resolvable:$true] %s229_s9 }
  0x6f   : > { %p4600_p1 = pneg %p3594_p6  ;;  %s3289_s1 = scalar_lea.hbm %s4549_s2, 192 }
  0x70   : > { %p3290_p13 = scmp.lt.u32.totalorder %s3731_s18, %s4549_s2  ;;  %p3291_p12 = scmp.lt.u32.totalorder %s3289_s1, %s3284_s10 }
  0x71   : > { %p3287_p0 = pnand %p3285_p4, %p4600_p1  ;;  %p3293_p7 = scmp.lt.u32.totalorder %s3284_s10, %s3731_s18 }
  0x72   : > { %p3292_p10 = por %p3291_p12, %p3290_p13 }
  0x73   : > { %p3288_p8 = pneg %p3287_p0 }
  0x74   : > { %p3294_p11 = por %p3293_p7, %p3292_p10 }
  0x76   : > { %p3295_p5 = pnand %p3294_p11, %p3288_p8 }
  0x78   : > { %3298 = shalt.err (!%p3295_p5)
}
  0x79   : > { %s3299_s3 = scalar_lea.vmem %s230_s9, 64  ;;  %p4601_p3 = pmov %p4600_p1 }
  0x7a   : > { %p3300_p2 = scmp.ne.s32.totalorder %s230_s9, %s3299_s3  ;;  %s3471_s20 = smov [#allocation8]  }
  0x7b   : > { %s3304_s21 = sshll.u32 %s3471_s20, 4  ;;  %s3305_s21 = int_to_ptr.vmem [resolvable:$false] %s3304_s21 }
  0x7c   : > { %p3302_p9 = pnand %p3300_p2, %p4601_p3  ;;  %s3306_s5 = scalar_lea.vmem %s3305_s21, 128 }
  0x7d   : > { %p3307_p1 = scmp.lt.s32.totalorder %s230_s9, %s3305_s21  ;;  %p3308_p0 = scmp.lt.s32.totalorder %s3306_s5, %s3299_s3 }
  0x7e   : > { %p3303_p4 = pneg %p3302_p9 }
  0x7f   : > { %p3309_p12 = por %p3308_p0, %p3307_p1 }
  0x81   : > { %p3310_p13 = pnand %p3309_p12, %p3303_p4 }
  0x83   : > { %3313 = shalt.err (!%p3310_p13)
}
  0x84   : > { %3099 = dma.hbm_to_vmem [thread:$0]  (!%p3594_p6), %s3731_s18, 64, %s230_s9, %s3601_s30  }
  0x85   : > { %p4602_p8 = scmp.ne.s32.totalorder %s4581_s29, 0 }
  0x86   : > { %s240_s14 = sand.u32 (!%p4602_p8), 1, %s3440_s19   ;;  %p4603_p10 = scmp.ne.s32.totalorder (!%p4602_p8), %s4586_s27, 0 }
  0x87   : > { %238 = sbr.rel (%p4602_p8) target bundleno = 700 (0x2bc), region = 32  ;;  %s2682_s23 = sshll.u32 (!%p4602_p8), %s240_s14, 10 }
  0x88   : > { %s241_s15 = scalar_lea.sflag (!%p4602_p8), [#allocation4], %s240_s14  ;;  %s3788_s26 = scalar_lea.vmem (!%p4602_p8), [#allocation3], %s2682_s23 }
  0x8e   : > { %3399 = dma.done.wait (%p4603_p10), %s241_s15, 16384  }
  0x8f   : > { %3401 = vsyncadd (%p4603_p10), %s241_s15, 4294950912  ;;  %s249_s30 = sand.u32 1, %s3639_s4   ;;  %s251_s11 = sand.u32 1, %s3428_s16  }
  0x90   : > { %s2683_s29 = sshll.u32 %s251_s11, 11  ;;  %s250_s18 = scalar_lea.sflag [#allocation7], %s249_s30 }
  0x91   : > { %s3798_s9 = scalar_lea.vmem [#allocation6], %s2683_s29  ;;  %p4604_p6 = scmp.ne.s32.totalorder %s4588_s7, 0 }
  0x93   : > { %3403 = dma.done.wait (%p4604_p6), %s250_s18, 32832  }
  0x94   : > { %3405 = vsyncadd (%p4604_p6), %s250_s18, 4294934464  ;;  %v713_v0 = vld [vmem:[%s3798_s9 + $0x8] sm:$0xff]  ;;  %v715_v2 = vld [vmem:[%s3798_s9 + $0x18] sm:$0xff]  ;;  %s2684_s7 = sshll.u32 %s251_s11, 2  ;;  %s292_s4 = sand.u32 1, %s3416_s13  }
  0x95   : > { %v717_v1 = vld [vmem:[%s3798_s9 + $0x28] sm:$0xff]  ;;  %v719_v4 = vld [vmem:[%s3798_s9 + $0x38] sm:$0xff]  ;;  %v712_v5 = vld [vmem:[%s3798_s9] sm:$0xff]  ;;  %s262_s27 = scalar_lea.vmem [#allocation8], %s2684_s7  ;;  %s2685_s10 = sshll.u32 %s292_s4, 10 }
  0x96   : > { %v2697_v3 = vpack.c.bf16 %v717_v1, %v713_v0  ;;  %v716_v6 = vld [vmem:[%s3798_s9 + $0x20] sm:$0xff]  ;;  %v2825_v7 = vpack.c.bf16 %v719_v4, %v715_v2  ;;  %v714_v9 = vld [vmem:[%s3798_s9 + $0x10] sm:$0xff]  ;;  %v721_v11 = vld [vmem:[%s3798_s9 + $0x48] sm:$0xff]  ;;  %s4204_s6 = scalar_lea.vmem [#allocation9], %s2685_s10  ;;  %s4605_s24 = sld [smem:[#allocation17_spill]] }
  0x97   : > { %v2699_v8 = vpack.c.bf16 %v716_v6, %v712_v5  ;;  %v718_v10 = vld [vmem:[%s3798_s9 + $0x30] sm:$0xff]  ;;  %v725_v13 = vld [vmem:[%s3798_s9 + $0x68] sm:$0xff]  ;;  %v723_v14 = vld [vmem:[%s3798_s9 + $0x58] sm:$0xff]  ;;  %s4606_s1 = sld [smem:[#allocation16_spill]]  ;;  %s2528_s21 = sshll.u32 %s4204_s6, 4  ;;  %s4462_s21 = int_to_ptr.vmem [resolvable:$true] %s2528_s21 }
  0x98   : > { %2698 = vmatprep.subr.bf16.mxu0 %v2697_v3  ;;  %v2827_v12 = vpack.c.bf16 %v718_v10, %v714_v9  ;;  %v727_v15 = vld [vmem:[%s3798_s9 + $0x78] sm:$0xff]  ;;  %2826 = vmatprep.subr.bf16.mxu1 %v2825_v7  ;;  %v2701_v16 = vpack.c.bf16 %v725_v13, %v721_v11  ;;  %v720_v18 = vld [vmem:[%s3798_s9 + $0x40] sm:$0xff]  ;;  %v722_v20 = vld [vmem:[%s3798_s9 + $0x50] sm:$0xff]  ;;  %s4607_s23 = sld [smem:[#allocation26_spill]]  ;;  %s4471_s30 = scalar_lea.sflag [#allocation5], %s292_s4 }
  0x99   : > { %2700 = vmatpush1.bf16.msra.mxu0 %v2699_v8  ;;  %v2829_v17 = vpack.c.bf16 %v727_v15, %v723_v14  ;;  %v724_v19 = vld [vmem:[%s3798_s9 + $0x60] sm:$0xff]  ;;  %v726_v22 = vld [vmem:[%s3798_s9 + $0x70] sm:$0xff]  ;;  %v729_v23 = vld [vmem:[%s3798_s9 + $0x88] sm:$0xff]  ;;  %s3314_s11 = scalar_lea.vmem %s4462_s21, 16384  ;;  %p4609_p11 = scmp.ne.s32.totalorder %s4593_s28, 0 }
  0x9a   : > { %2828 = vmatpush1.bf16.msra.mxu1 %v2827_v12  ;;  %v2703_v21 = vpack.c.bf16 %v724_v19, %v720_v18  ;;  %v733_v24 = vld [vmem:[%s3798_s9 + $0xa8] sm:$0xff]  ;;  %2702 = vmatprep.subr.bf16.mxu0 %v2701_v16  ;;  %v2831_v25 = vpack.c.bf16 %v726_v22, %v722_v20  ;;  %v731_v27 = vld [vmem:[%s3798_s9 + $0x98] sm:$0xff]  ;;  %v728_v29 = vld [vmem:[%s3798_s9 + $0x80] sm:$0xff]  ;;  %p3315_p7 = scmp.ne.s32.totalorder %s4462_s21, %s3314_s11  ;;  %s3472_s29 = smov [#allocation9]  }
  0x9b   : > { %2830 = vmatprep.subr.bf16.mxu1 %v2829_v17  ;;  %v2705_v26 = vpack.c.bf16 %v733_v24, %v729_v23  ;;  %v735_v28 = vld [vmem:[%s3798_s9 + $0xb8] sm:$0xff]  ;;  %v732_v31 = vld [vmem:[%s3798_s9 + $0xa0] sm:$0xff]  ;;  %v730_v32 = vld [vmem:[%s3798_s9 + $0x90] sm:$0xff]  ;;  %s3318_s18 = sshll.u32 %s3472_s29, 4  ;;  %s3319_s18 = int_to_ptr.vmem [resolvable:$false] %s3318_s18 }
  0x9c   : > { %v2833_v30 = vpack.c.bf16 %v735_v28, %v731_v27  ;;  %v734_v33 = vld [vmem:[%s3798_s9 + $0xb0] sm:$0xff]  ;;  %v2707_v34 = vpack.c.bf16 %v732_v31, %v728_v29  ;;  %v737_v35 = vld [vmem:[%s3798_s9 + $0xc8] sm:$0xff]  ;;  %v739_v37 = vld [vmem:[%s3798_s9 + $0xd8] sm:$0xff]  ;;  %s3081_s17 = smul.u32 384, %s4605_s24  ;;  %p3316_p5 = pnand %p3315_p7, %p4609_p11 }
  0x9d   : > { %2704 = vmatpush1.bf16.msra.mxu0 %v2703_v21  ;;  %v741_v36 = vld [vmem:[%s3798_s9 + $0xe8] sm:$0xff]  ;;  %v2835_v38 = vpack.c.bf16 %v734_v33, %v730_v32  ;;  %v743_v40 = vld [vmem:[%s3798_s9 + $0xf8] sm:$0xff]  ;;  %v736_v41 = vld [vmem:[%s3798_s9 + $0xc0] sm:$0xff]  ;;  %s2688_s22 = sshll.u32 %s4606_s1, 2  ;;  %p3321_p3 = scmp.lt.s32.totalorder %s4462_s21, %s3319_s18 }
  0x9e   : > { %2832 = vmatpush1.bf16.msra.mxu1 %v2831_v25  ;;  %2706 = vmatprep.subr.bf16.mxu0 %v2705_v26  ;;  %v2709_v39 = vpack.c.bf16 %v741_v36, %v737_v35  ;;  %v740_v42 = vld [vmem:[%s3798_s9 + $0xe0] sm:$0xff]  ;;  %v2837_v43 = vpack.c.bf16 %v743_v40, %v739_v37  ;;  %v738_v44 = vld [vmem:[%s3798_s9 + $0xd0] sm:$0xff]  ;;  %v745_v46 = vld [vmem:[%s3798_s9 + $0x108] sm:$0xff]  ;;  %s2525_s3 = sadd.s32 %s3081_s17, %s2688_s22  ;;  %p3317_p2 = pneg %p3316_p5 }
  0x9f   : > { %2834 = vmatprep.subr.bf16.mxu1 %v2833_v30  ;;  %v742_v45 = vld [vmem:[%s3798_s9 + $0xf0] sm:$0xff]  ;;  %v749_v47 = vld [vmem:[%s3798_s9 + $0x128] sm:$0xff]  ;;  %v747_v48 = vld [vmem:[%s3798_s9 + $0x118] sm:$0xff]  ;;  %v2711_v50 = vpack.c.bf16 %v740_v42, %v736_v41  ;;  %s2690_s20 = sshll.u32 %s2525_s3, 7 }
  0xa0   : > { %v751_v49 = vld [vmem:[%s3798_s9 + $0x138] sm:$0xff]  ;;  %v2839_v51 = vpack.c.bf16 %v742_v45, %v738_v44  ;;  %v2713_v52 = vpack.c.bf16 %v749_v47, %v745_v46  ;;  %v744_v53 = vld [vmem:[%s3798_s9 + $0x100] sm:$0xff]  ;;  %v746_v55 = vld [vmem:[%s3798_s9 + $0x110] sm:$0xff]  ;;  %s4458_s15 = scalar_lea.hbm %s4607_s23, %s2690_s20 }
  0xa1   : > { %2708 = vmatpush1.bf16.msra.mxu0 %v2707_v34  ;;  %v748_v54 = vld [vmem:[%s3798_s9 + $0x120] sm:$0xff]  ;;  %v2841_v56 = vpack.c.bf16 %v751_v49, %v747_v48  ;;  %v750_v57 = vld [vmem:[%s3798_s9 + $0x130] sm:$0xff]  ;;  %v753_v58 = vld [vmem:[%s3798_s9 + $0x148] sm:$0xff] }
  0xa2   : > { %2836 = vmatpush1.bf16.msra.mxu1 %v2835_v38  ;;  %2710 = vmatprep.subr.bf16.mxu0 %v2709_v39  ;;  %v757_v59 = vld [vmem:[%s3798_s9 + $0x168] sm:$0xff]  ;;  %v755_v60 = vld [vmem:[%s3798_s9 + $0x158] sm:$0xff]  ;;  %v2715_v62 = vpack.c.bf16 %v748_v54, %v744_v53  ;;  %v2843_v63 = vpack.c.bf16 %v750_v57, %v746_v55  ;;  %v752_v1 = vld [vmem:[%s3798_s9 + $0x140] sm:$0xff] }
  0xa3   : > { %2838 = vmatprep.subr.bf16.mxu1 %v2837_v43  ;;  %v759_v61 = vld [vmem:[%s3798_s9 + $0x178] sm:$0xff]  ;;  %v2717_v0 = vpack.c.bf16 %v757_v59, %v753_v58  ;;  %v756_v2 = vld [vmem:[%s3798_s9 + $0x160] sm:$0xff]  ;;  %v754_v3 = vld [vmem:[%s3798_s9 + $0x150] sm:$0xff] }
  0xa4   : > { %v2845_v4 = vpack.c.bf16 %v759_v61, %v755_v60  ;;  %v758_v5 = vld [vmem:[%s3798_s9 + $0x170] sm:$0xff]  ;;  %v761_v6 = vld [vmem:[%s3798_s9 + $0x188] sm:$0xff]  ;;  %v763_v8 = vld [vmem:[%s3798_s9 + $0x198] sm:$0xff]  ;;  %v2719_v10 = vpack.c.bf16 %v756_v2, %v752_v1 }
  0xa5   : > { %2712 = vmatpush1.bf16.msra.mxu0 %v2711_v50  ;;  %v765_v7 = vld [vmem:[%s3798_s9 + $0x1a8] sm:$0xff]  ;;  %v767_v9 = vld [vmem:[%s3798_s9 + $0x1b8] sm:$0xff]  ;;  %v2847_v11 = vpack.c.bf16 %v758_v5, %v754_v3  ;;  %v760_v13 = vld [vmem:[%s3798_s9 + $0x180] sm:$0xff] }
  0xa6   : > { %2840 = vmatpush1.bf16.msra.mxu1 %v2839_v51  ;;  %2714 = vmatprep.subr.bf16.mxu0 %v2713_v52  ;;  %v2721_v12 = vpack.c.bf16 %v765_v7, %v761_v6  ;;  %v764_v14 = vld [vmem:[%s3798_s9 + $0x1a0] sm:$0xff]  ;;  %v762_v15 = vld [vmem:[%s3798_s9 + $0x190] sm:$0xff]  ;;  %v2849_v16 = vpack.c.bf16 %v767_v9, %v763_v8  ;;  %v769_v18 = vld [vmem:[%s3798_s9 + $0x1c8] sm:$0xff] }
  0xa7   : > { %2842 = vmatprep.subr.bf16.mxu1 %v2841_v56  ;;  %v766_v17 = vld [vmem:[%s3798_s9 + $0x1b0] sm:$0xff]  ;;  %v773_v19 = vld [vmem:[%s3798_s9 + $0x1e8] sm:$0xff]  ;;  %v771_v20 = vld [vmem:[%s3798_s9 + $0x1d8] sm:$0xff]  ;;  %v2723_v22 = vpack.c.bf16 %v764_v14, %v760_v13 }
  0xa8   : > { %v775_v21 = vld [vmem:[%s3798_s9 + $0x1f8] sm:$0xff]  ;;  %v2851_v23 = vpack.c.bf16 %v766_v17, %v762_v15  ;;  %v2725_v24 = vpack.c.bf16 %v773_v19, %v769_v18  ;;  %v768_v25 = vld [vmem:[%s3798_s9 + $0x1c0] sm:$0xff]  ;;  %v770_v27 = vld [vmem:[%s3798_s9 + $0x1d0] sm:$0xff] }
  0xa9   : > { %2716 = vmatpush1.bf16.msra.mxu0 %v2715_v62  ;;  %v772_v26 = vld [vmem:[%s3798_s9 + $0x1e0] sm:$0xff]  ;;  %v2853_v28 = vpack.c.bf16 %v775_v21, %v771_v20  ;;  %v774_v29 = vld [vmem:[%s3798_s9 + $0x1f0] sm:$0xff]  ;;  %v777_v30 = vld [vmem:[%s3798_s9 + $0x208] sm:$0xff] }
  0xaa   : > { %2844 = vmatpush1.bf16.msra.mxu1 %v2843_v63  ;;  %2718 = vmatprep.subr.bf16.mxu0 %v2717_v0  ;;  %v781_v31 = vld [vmem:[%s3798_s9 + $0x228] sm:$0xff]  ;;  %v779_v32 = vld [vmem:[%s3798_s9 + $0x218] sm:$0xff]  ;;  %v2727_v34 = vpack.c.bf16 %v772_v26, %v768_v25  ;;  %v2855_v35 = vpack.c.bf16 %v774_v29, %v770_v27  ;;  %v776_v37 = vld [vmem:[%s3798_s9 + $0x200] sm:$0xff] }
  0xab   : > { %2846 = vmatprep.subr.bf16.mxu1 %v2845_v4  ;;  %v783_v33 = vld [vmem:[%s3798_s9 + $0x238] sm:$0xff]  ;;  %v2729_v36 = vpack.c.bf16 %v781_v31, %v777_v30  ;;  %v780_v38 = vld [vmem:[%s3798_s9 + $0x220] sm:$0xff]  ;;  %v778_v39 = vld [vmem:[%s3798_s9 + $0x210] sm:$0xff] }
  0xac   : > { %v2857_v40 = vpack.c.bf16 %v783_v33, %v779_v32  ;;  %v782_v41 = vld [vmem:[%s3798_s9 + $0x230] sm:$0xff]  ;;  %v785_v42 = vld [vmem:[%s3798_s9 + $0x248] sm:$0xff]  ;;  %v787_v44 = vld [vmem:[%s3798_s9 + $0x258] sm:$0xff]  ;;  %v2731_v46 = vpack.c.bf16 %v780_v38, %v776_v37 }
  0xad   : > { %2720 = vmatpush1.bf16.msra.mxu0 %v2719_v10  ;;  %v789_v43 = vld [vmem:[%s3798_s9 + $0x268] sm:$0xff]  ;;  %v791_v45 = vld [vmem:[%s3798_s9 + $0x278] sm:$0xff]  ;;  %v2859_v47 = vpack.c.bf16 %v782_v41, %v778_v39  ;;  %v784_v49 = vld [vmem:[%s3798_s9 + $0x240] sm:$0xff] }
  0xae   : > { %2848 = vmatpush1.bf16.msra.mxu1 %v2847_v11  ;;  %2722 = vmatprep.subr.bf16.mxu0 %v2721_v12  ;;  %v2733_v48 = vpack.c.bf16 %v789_v43, %v785_v42  ;;  %v788_v50 = vld [vmem:[%s3798_s9 + $0x260] sm:$0xff]  ;;  %v786_v51 = vld [vmem:[%s3798_s9 + $0x250] sm:$0xff]  ;;  %v2861_v52 = vpack.c.bf16 %v791_v45, %v787_v44  ;;  %v793_v54 = vld [vmem:[%s3798_s9 + $0x288] sm:$0xff] }
  0xaf   : > { %2850 = vmatprep.subr.bf16.mxu1 %v2849_v16  ;;  %v790_v53 = vld [vmem:[%s3798_s9 + $0x270] sm:$0xff]  ;;  %v797_v55 = vld [vmem:[%s3798_s9 + $0x2a8] sm:$0xff]  ;;  %v795_v56 = vld [vmem:[%s3798_s9 + $0x298] sm:$0xff]  ;;  %v2735_v58 = vpack.c.bf16 %v788_v50, %v784_v49 }
  0xb0   : > { %v799_v57 = vld [vmem:[%s3798_s9 + $0x2b8] sm:$0xff]  ;;  %v2863_v59 = vpack.c.bf16 %v790_v53, %v786_v51  ;;  %v2737_v60 = vpack.c.bf16 %v797_v55, %v793_v54  ;;  %v792_v61 = vld [vmem:[%s3798_s9 + $0x280] sm:$0xff]  ;;  %v794_v63 = vld [vmem:[%s3798_s9 + $0x290] sm:$0xff] }
  0xb1   : > { %2724 = vmatpush1.bf16.msra.mxu0 %v2723_v22  ;;  %v796_v62 = vld [vmem:[%s3798_s9 + $0x2a0] sm:$0xff]  ;;  %v2865_v0 = vpack.c.bf16 %v799_v57, %v795_v56  ;;  %v798_v1 = vld [vmem:[%s3798_s9 + $0x2b0] sm:$0xff]  ;;  %v801_v2 = vld [vmem:[%s3798_s9 + $0x2c8] sm:$0xff] }
  0xb2   : > { %2852 = vmatpush1.bf16.msra.mxu1 %v2851_v23  ;;  %2726 = vmatprep.subr.bf16.mxu0 %v2725_v24  ;;  %v805_v3 = vld [vmem:[%s3798_s9 + $0x2e8] sm:$0xff]  ;;  %v803_v4 = vld [vmem:[%s3798_s9 + $0x2d8] sm:$0xff]  ;;  %v2739_v6 = vpack.c.bf16 %v796_v62, %v792_v61  ;;  %v800_v7 = vld [vmem:[%s3798_s9 + $0x2c0] sm:$0xff]  ;;  %v2867_v8 = vpack.c.bf16 %v798_v1, %v794_v63 }
  0xb3   : > { %2854 = vmatprep.subr.bf16.mxu1 %v2853_v28  ;;  %v807_v5 = vld [vmem:[%s3798_s9 + $0x2f8] sm:$0xff]  ;;  %v2741_v9 = vpack.c.bf16 %v805_v3, %v801_v2  ;;  %v804_v10 = vld [vmem:[%s3798_s9 + $0x2e0] sm:$0xff]  ;;  %v802_v11 = vld [vmem:[%s3798_s9 + $0x2d0] sm:$0xff] }
  0xb4   : > { %v806_v12 = vld [vmem:[%s3798_s9 + $0x2f0] sm:$0xff]  ;;  %v2869_v13 = vpack.c.bf16 %v807_v5, %v803_v4  ;;  %v809_v14 = vld [vmem:[%s3798_s9 + $0x308] sm:$0xff]  ;;  %v811_v17 = vld [vmem:[%s3798_s9 + $0x318] sm:$0xff]  ;;  %v2743_v19 = vpack.c.bf16 %v804_v10, %v800_v7 }
  0xb5   : > { %2728 = vmatpush1.bf16.msra.mxu0 %v2727_v34  ;;  %v813_v15 = vld [vmem:[%s3798_s9 + $0x328] sm:$0xff]  ;;  %v815_v18 = vld [vmem:[%s3798_s9 + $0x338] sm:$0xff]  ;;  %v2871_v20 = vpack.c.bf16 %v806_v12, %v802_v11  ;;  %v808_v22 = vld [vmem:[%s3798_s9 + $0x300] sm:$0xff] }
  0xb6   : > { %2856 = vmatpush1.bf16.msra.mxu1 %v2855_v35  ;;  %2730 = vmatprep.subr.bf16.mxu0 %v2729_v36  ;;  %v585_v16 = vld [vmem:[%s3788_s26 + $0x8] sm:$0xff]  ;;  %v2745_v21 = vpack.c.bf16 %v813_v15, %v809_v14  ;;  %v812_v23 = vld [vmem:[%s3798_s9 + $0x320] sm:$0xff]  ;;  %v810_v24 = vld [vmem:[%s3798_s9 + $0x310] sm:$0xff]  ;;  %v2873_v25 = vpack.c.bf16 %v815_v18, %v811_v17 }
  0xb7   : > { %2858 = vmatprep.subr.bf16.mxu1 %v2857_v40  ;;  %1032 = vmatprep.mubr.f32.mxu0 %v585_v16  ;;  %v814_v26 = vld [vmem:[%s3798_s9 + $0x330] sm:$0xff]  ;;  %v817_v27 = vld [vmem:[%s3798_s9 + $0x348] sm:$0xff]  ;;  %v819_v29 = vld [vmem:[%s3798_s9 + $0x358] sm:$0xff]  ;;  %v2747_v31 = vpack.c.bf16 %v812_v23, %v808_v22 }
  0xb8   : > { %1546 = vmatprep.mubr.f32.mxu1 %v585_v16  ;;  %v821_v28 = vld [vmem:[%s3798_s9 + $0x368] sm:$0xff]  ;;  %v823_v30 = vld [vmem:[%s3798_s9 + $0x378] sm:$0xff]  ;;  %v2875_v32 = vpack.c.bf16 %v814_v26, %v810_v24  ;;  %v816_v34 = vld [vmem:[%s3798_s9 + $0x340] sm:$0xff] }
  0xb9   : > { %2732 = vmatpush1.bf16.msra.mxu0 %v2731_v46  ;;  %v2749_v33 = vpack.c.bf16 %v821_v28, %v817_v27  ;;  %v820_v35 = vld [vmem:[%s3798_s9 + $0x360] sm:$0xff]  ;;  %v818_v36 = vld [vmem:[%s3798_s9 + $0x350] sm:$0xff]  ;;  %v2877_v37 = vpack.c.bf16 %v823_v30, %v819_v29  ;;  %v825_v39 = vld [vmem:[%s3798_s9 + $0x388] sm:$0xff] }
  0xba   : > { %2860 = vmatpush1.bf16.msra.mxu1 %v2859_v47  ;;  %2734 = vmatprep.subr.bf16.mxu0 %v2733_v48  ;;  %v822_v38 = vld [vmem:[%s3798_s9 + $0x370] sm:$0xff]  ;;  %v829_v40 = vld [vmem:[%s3798_s9 + $0x3a8] sm:$0xff]  ;;  %v827_v41 = vld [vmem:[%s3798_s9 + $0x398] sm:$0xff]  ;;  %v2751_v43 = vpack.c.bf16 %v820_v35, %v816_v34 }
  0xbb   : > { %2862 = vmatprep.subr.bf16.mxu1 %v2861_v52  ;;  %v831_v42 = vld [vmem:[%s3798_s9 + $0x3b8] sm:$0xff]  ;;  %v2879_v44 = vpack.c.bf16 %v822_v38, %v818_v36  ;;  %v2753_v45 = vpack.c.bf16 %v829_v40, %v825_v39  ;;  %v824_v46 = vld [vmem:[%s3798_s9 + $0x380] sm:$0xff]  ;;  %v826_v48 = vld [vmem:[%s3798_s9 + $0x390] sm:$0xff] }
  0xbc   : > { %v828_v47 = vld [vmem:[%s3798_s9 + $0x3a0] sm:$0xff]  ;;  %v2881_v49 = vpack.c.bf16 %v831_v42, %v827_v41  ;;  %v830_v50 = vld [vmem:[%s3798_s9 + $0x3b0] sm:$0xff]  ;;  %v833_v51 = vld [vmem:[%s3798_s9 + $0x3c8] sm:$0xff] }
  0xbd   : > { %2736 = vmatpush1.bf16.msra.mxu0 %v2735_v58  ;;  %v837_v52 = vld [vmem:[%s3798_s9 + $0x3e8] sm:$0xff]  ;;  %v835_v53 = vld [vmem:[%s3798_s9 + $0x3d8] sm:$0xff]  ;;  %v2755_v55 = vpack.c.bf16 %v828_v47, %v824_v46  ;;  %v2883_v56 = vpack.c.bf16 %v830_v50, %v826_v48  ;;  %v832_v58 = vld [vmem:[%s3798_s9 + $0x3c0] sm:$0xff] }
  0xbe   : > { %2864 = vmatpush1.bf16.msra.mxu1 %v2863_v59  ;;  %2738 = vmatprep.subr.bf16.mxu0 %v2737_v60  ;;  %v839_v54 = vld [vmem:[%s3798_s9 + $0x3f8] sm:$0xff]  ;;  %v2757_v57 = vpack.c.bf16 %v837_v52, %v833_v51  ;;  %v836_v59 = vld [vmem:[%s3798_s9 + $0x3e0] sm:$0xff]  ;;  %v834_v60 = vld [vmem:[%s3798_s9 + $0x3d0] sm:$0xff] }
  0xbf   : > { %2866 = vmatprep.subr.bf16.mxu1 %v2865_v0  ;;  %v2885_v61 = vpack.c.bf16 %v839_v54, %v835_v53  ;;  %v838_v62 = vld [vmem:[%s3798_s9 + $0x3f0] sm:$0xff]  ;;  %v841_v63 = vld [vmem:[%s3798_s9 + $0x408] sm:$0xff]  ;;  %v843_v1 = vld [vmem:[%s3798_s9 + $0x418] sm:$0xff]  ;;  %v2759_v3 = vpack.c.bf16 %v836_v59, %v832_v58 }
  0xc0   : > { %v845_v0 = vld [vmem:[%s3798_s9 + $0x428] sm:$0xff]  ;;  %v847_v2 = vld [vmem:[%s3798_s9 + $0x438] sm:$0xff]  ;;  %v2887_v4 = vpack.c.bf16 %v838_v62, %v834_v60  ;;  %v844_v7 = vld [vmem:[%s3798_s9 + $0x420] sm:$0xff] }
  0xc1   : > { %2740 = vmatpush1.bf16.msra.mxu0 %v2739_v6  ;;  %v2761_v5 = vpack.c.bf16 %v845_v0, %v841_v63  ;;  %v840_v6 = vld [vmem:[%s3798_s9 + $0x400] sm:$0xff]  ;;  %v846_v10 = vld [vmem:[%s3798_s9 + $0x430] sm:$0xff]  ;;  %v849_v11 = vld [vmem:[%s3798_s9 + $0x448] sm:$0xff] }
  0xc2   : > { %2868 = vmatpush1.bf16.msra.mxu1 %v2867_v8  ;;  %2742 = vmatprep.subr.bf16.mxu0 %v2741_v9  ;;  %v2889_v8 = vpack.c.bf16 %v847_v2, %v843_v1  ;;  %v842_v9 = vld [vmem:[%s3798_s9 + $0x410] sm:$0xff]  ;;  %v853_v12 = vld [vmem:[%s3798_s9 + $0x468] sm:$0xff]  ;;  %v2763_v14 = vpack.c.bf16 %v844_v7, %v840_v6  ;;  %v851_v15 = vld [vmem:[%s3798_s9 + $0x458] sm:$0xff] }
  0xc3   : > { %2870 = vmatprep.subr.bf16.mxu1 %v2869_v13  ;;  %v584_v13 = vld [vmem:[%s3788_s26] sm:$0xff]  ;;  %v855_v16 = vld [vmem:[%s3798_s9 + $0x478] sm:$0xff]  ;;  %v2891_v17 = vpack.c.bf16 %v846_v10, %v842_v9  ;;  %v589_v18 = vld [vmem:[%s3788_s26 + $0x28] sm:$0xff] }
  0xc4   : > { %v850_v22 = vld [vmem:[%s3798_s9 + $0x450] sm:$0xff]  ;;  %v2893_v23 = vpack.c.bf16 %v855_v16, %v851_v15  ;;  %v861_v26 = vld [vmem:[%s3798_s9 + $0x4a8] sm:$0xff]  ;;  %v588_v27 = vld [vmem:[%s3788_s26 + $0x20] sm:$0xff] }
  0xc5   : > { %2744 = vmatpush1.bf16.msra.mxu0 %v2743_v19  ;;  %v2765_v19 = vpack.c.bf16 %v853_v12, %v849_v11  ;;  %v854_v24 = vld [vmem:[%s3798_s9 + $0x470] sm:$0xff]  ;;  %v859_v28 = vld [vmem:[%s3798_s9 + $0x498] sm:$0xff]  ;;  %v593_v30 = vld [vmem:[%s3788_s26 + $0x48] sm:$0xff] }
  0xc6   : > { %2872 = vmatpush1.bf16.msra.mxu1 %v2871_v20  ;;  %2746 = vmatprep.subr.bf16.mxu0 %v2745_v21  ;;  %v848_v20 = vld [vmem:[%s3798_s9 + $0x440] sm:$0xff]  ;;  %v863_v29 = vld [vmem:[%s3798_s9 + $0x4b8] sm:$0xff]  ;;  %v858_v36 = vld [vmem:[%s3798_s9 + $0x490] sm:$0xff] }
  0xc7   : > { %2874 = vmatprep.subr.bf16.mxu1 %v2873_v25  ;;  %v852_v21 = vld [vmem:[%s3798_s9 + $0x460] sm:$0xff]  ;;  %v857_v25 = vld [vmem:[%s3798_s9 + $0x488] sm:$0xff]  ;;  %v862_v38 = vld [vmem:[%s3798_s9 + $0x4b0] sm:$0xff] }
  0xc8   : > { %v856_v34 = vld [vmem:[%s3798_s9 + $0x480] sm:$0xff]  ;;  %v865_v39 = vld [vmem:[%s3798_s9 + $0x4c8] sm:$0xff]  ;;  %v867_v42 = vld [vmem:[%s3798_s9 + $0x4d8] sm:$0xff]  ;;  %v2899_v46 = vpack.c.bf16 %v862_v38, %v858_v36 }
  0xc9   : > { %2748 = vmatpush1.bf16.msra.mxu0 %v2747_v31  ;;  %v2767_v31 = vpack.c.bf16 %v852_v21, %v848_v20  ;;  %v860_v35 = vld [vmem:[%s3798_s9 + $0x4a0] sm:$0xff]  ;;  %v869_v40 = vld [vmem:[%s3798_s9 + $0x4e8] sm:$0xff]  ;;  %v866_v50 = vld [vmem:[%s3798_s9 + $0x4d0] sm:$0xff] }
  0xca   : > { %2876 = vmatpush1.bf16.msra.mxu1 %v2875_v32  ;;  %2750 = vmatprep.subr.bf16.mxu0 %v2749_v33  ;;  %v2895_v32 = vpack.c.bf16 %v854_v24, %v850_v22  ;;  %v2769_v33 = vpack.c.bf16 %v861_v26, %v857_v25  ;;  %v592_v41 = vld [vmem:[%s3788_s26 + $0x40] sm:$0xff]  ;;  %v2773_v47 = vpack.c.bf16 %v869_v40, %v865_v39  ;;  %v870_v52 = vld [vmem:[%s3798_s9 + $0x4f0] sm:$0xff]  ;;  %v873_v53 = vld [vmem:[%s3798_s9 + $0x508] sm:$0xff] }
  0xcb   : > { %2878 = vmatprep.subr.bf16.mxu1 %v2877_v37  ;;  %v2897_v37 = vpack.c.bf16 %v863_v29, %v859_v28  ;;  %v864_v48 = vld [vmem:[%s3798_s9 + $0x4c0] sm:$0xff]  ;;  %v877_v54 = vld [vmem:[%s3798_s9 + $0x528] sm:$0xff]  ;;  %v2903_v60 = vpack.c.bf16 %v870_v52, %v866_v50  ;;  %v874_v0 = vld [vmem:[%s3798_s9 + $0x510] sm:$0xff] }
  0xcc   : > { %v601_v58 = vld [vmem:[%s3788_s26 + $0x88] sm:$0xff]  ;;  %v872_v62 = vld [vmem:[%s3798_s9 + $0x500] sm:$0xff]  ;;  %v878_v2 = vld [vmem:[%s3798_s9 + $0x530] sm:$0xff] }
  0xcd   : > { %2752 = vmatpush1.bf16.msra.mxu0 %v2751_v43  ;;  %v871_v43 = vld [vmem:[%s3798_s9 + $0x4f8] sm:$0xff]  ;;  %v876_v63 = vld [vmem:[%s3798_s9 + $0x520] sm:$0xff]  ;;  %v2907_v10 = vpack.c.bf16 %v878_v2, %v874_v0  ;;  %v886_v16 = vld [vmem:[%s3798_s9 + $0x570] sm:$0xff] }
  0xce   : > { %2880 = vmatpush1.bf16.msra.mxu1 %v2879_v44  ;;  %2754 = vmatprep.subr.bf16.mxu0 %v2753_v45  ;;  %v597_v44 = vld [vmem:[%s3788_s26 + $0x68] sm:$0xff]  ;;  %v2771_v45 = vpack.c.bf16 %v860_v35, %v856_v34  ;;  %v2901_v51 = vpack.c.bf16 %v871_v43, %v867_v42  ;;  %v883_v6 = vld [vmem:[%s3798_s9 + $0x558] sm:$0xff]  ;;  %v2779_v9 = vpack.c.bf16 %v876_v63, %v872_v62  ;;  %v880_v12 = vld [vmem:[%s3798_s9 + $0x540] sm:$0xff] }
  0xcf   : > { %2882 = vmatprep.subr.bf16.mxu1 %v2881_v49  ;;  %v868_v49 = vld [vmem:[%s3798_s9 + $0x4e0] sm:$0xff]  ;;  %v887_v7 = vld [vmem:[%s3798_s9 + $0x578] sm:$0xff]  ;;  %v609_v22 = vld [vmem:[%s3788_s26 + $0xc8] sm:$0xff] }
  0xd0   : > { %v2775_v59 = vpack.c.bf16 %v868_v49, %v864_v48  ;;  %v2909_v15 = vpack.c.bf16 %v887_v7, %v883_v6  ;;  %v891_v20 = vld [vmem:[%s3798_s9 + $0x598] sm:$0xff]  ;;  %v888_v26 = vld [vmem:[%s3798_s9 + $0x580] sm:$0xff]  ;;  %v890_v28 = vld [vmem:[%s3798_s9 + $0x590] sm:$0xff] }
  0xd1   : > { %2756 = vmatpush1.bf16.msra.mxu0 %v2755_v55  ;;  %v596_v55 = vld [vmem:[%s3788_s26 + $0x60] sm:$0xff]  ;;  %v895_v21 = vld [vmem:[%s3798_s9 + $0x5b8] sm:$0xff]  ;;  %v613_v36 = vld [vmem:[%s3788_s26 + $0xe8] sm:$0xff] }
  0xd2   : > { %2884 = vmatpush1.bf16.msra.mxu1 %v2883_v56  ;;  %2758 = vmatprep.subr.bf16.mxu0 %v2757_v57  ;;  %v875_v56 = vld [vmem:[%s3798_s9 + $0x518] sm:$0xff]  ;;  %v2913_v29 = vpack.c.bf16 %v895_v21, %v891_v20  ;;  %v896_v40 = vld [vmem:[%s3798_s9 + $0x5c0] sm:$0xff]  ;;  %v898_v42 = vld [vmem:[%s3798_s9 + $0x5d0] sm:$0xff] }
  0xd3   : > { %2886 = vmatprep.subr.bf16.mxu1 %v2885_v61  ;;  %v879_v57 = vld [vmem:[%s3798_s9 + $0x538] sm:$0xff]  ;;  %v2777_v61 = vpack.c.bf16 %v877_v54, %v873_v53  ;;  %v617_v50 = vld [vmem:[%s3788_s26 + $0x108] sm:$0xff]  ;;  %v904_v54 = vld [vmem:[%s3798_s9 + $0x600] sm:$0xff] }
  0xd4   : > { %v2905_v1 = vpack.c.bf16 %v879_v57, %v875_v56  ;;  %v899_v34 = vld [vmem:[%s3798_s9 + $0x5d8] sm:$0xff]  ;;  %v906_v56 = vld [vmem:[%s3798_s9 + $0x610] sm:$0xff]  ;;  %v621_v0 = vld [vmem:[%s3788_s26 + $0x128] sm:$0xff] }
  0xd5   : > { %2760 = vmatpush1.bf16.msra.mxu0 %v2759_v3  ;;  %v881_v3 = vld [vmem:[%s3798_s9 + $0x548] sm:$0xff]  ;;  %v903_v35 = vld [vmem:[%s3798_s9 + $0x5f8] sm:$0xff]  ;;  %v914_v6 = vld [vmem:[%s3798_s9 + $0x650] sm:$0xff] }
  0xd6   : > { %2888 = vmatpush1.bf16.msra.mxu1 %v2887_v4  ;;  %2762 = vmatprep.subr.bf16.mxu0 %v2761_v5  ;;  %v885_v4 = vld [vmem:[%s3798_s9 + $0x568] sm:$0xff]  ;;  %v600_v5 = vld [vmem:[%s3788_s26 + $0x80] sm:$0xff]  ;;  %v2917_v43 = vpack.c.bf16 %v903_v35, %v899_v34  ;;  %v907_v48 = vld [vmem:[%s3798_s9 + $0x618] sm:$0xff] }
  0xd7   : > { %2890 = vmatprep.subr.bf16.mxu1 %v2889_v8  ;;  %v605_v8 = vld [vmem:[%s3788_s26 + $0xa8] sm:$0xff]  ;;  %v2781_v11 = vpack.c.bf16 %v885_v4, %v881_v3  ;;  %v911_v49 = vld [vmem:[%s3798_s9 + $0x638] sm:$0xff]  ;;  %v912_v4 = vld [vmem:[%s3798_s9 + $0x640] sm:$0xff] }
  0xd8   : > { %1033 = vmatmul.mubr.f32.vlgmr.msra.gmra.mrb[0].mxu0 %v584_v13  ;;  %v2921_v57 = vpack.c.bf16 %v911_v49, %v907_v48  ;;  %v915_v62 = vld [vmem:[%s3798_s9 + $0x658] sm:$0xff]  ;;  %v922_v20 = vld [vmem:[%s3798_s9 + $0x690] sm:$0xff] }
  0xd9   : > { %1547 = vmatmul.mubr.f32.vlgmr.msra.gmra.mrb[0].mxu1 %v584_v13  ;;  %2764 = vmatpush1.bf16.msra.mxu0 %v2763_v14  ;;  %v884_v13 = vld [vmem:[%s3798_s9 + $0x560] sm:$0xff]  ;;  %v882_v14 = vld [vmem:[%s3798_s9 + $0x550] sm:$0xff]  ;;  %v919_v63 = vld [vmem:[%s3798_s9 + $0x678] sm:$0xff] }
  0xda   : > { %2892 = vmatpush1.bf16.msra.mxu1 %v2891_v17  ;;  %1038 = vmatprep.mubr.f32.mxu0 %v589_v18  ;;  %v889_v17 = vld [vmem:[%s3798_s9 + $0x588] sm:$0xff]  ;;  %v2911_v24 = vpack.c.bf16 %v886_v16, %v882_v14  ;;  %v2925_v7 = vpack.c.bf16 %v919_v63, %v915_v62  ;;  %v930_v34 = vld [vmem:[%s3798_s9 + $0x6d0] sm:$0xff] }
  0xdb   : > { %1552 = vmatprep.mubr.f32.mxu1 %v589_v18  ;;  %2766 = vmatprep.subr.bf16.mxu0 %v2765_v19  ;;  %v893_v18 = vld [vmem:[%s3798_s9 + $0x5a8] sm:$0xff]  ;;  %v604_v19 = vld [vmem:[%s3788_s26 + $0xa0] sm:$0xff]  ;;  %v938_v48 = vld [vmem:[%s3798_s9 + $0x710] sm:$0xff] }
  0xdc   : > { %1039 = vmatmul.mubr.f32.gmra.mrb[2].mxu0 %v588_v27  ;;  %2894 = vmatprep.subr.bf16.mxu1 %v2893_v23  ;;  %v2783_v23 = vpack.c.bf16 %v884_v13, %v880_v12  ;;  %v2785_v25 = vpack.c.bf16 %v893_v18, %v889_v17  ;;  %v923_v12 = vld [vmem:[%s3798_s9 + $0x698] sm:$0xff]  ;;  %v625_v14 = vld [vmem:[%s3788_s26 + $0x148] sm:$0xff]  ;;  %v920_v18 = vld [vmem:[%s3798_s9 + $0x680] sm:$0xff] }
  0xdd   : > { %1553 = vmatmul.mubr.f32.gmra.mrb[2].mxu1 %v588_v27  ;;  %1044 = vmatprep.mubr.f32.mxu0 %v593_v30  ;;  %v892_v27 = vld [vmem:[%s3798_s9 + $0x5a0] sm:$0xff]  ;;  %v927_v13 = vld [vmem:[%s3798_s9 + $0x6b8] sm:$0xff]  ;;  %v946_v62 = vld [vmem:[%s3798_s9 + $0x750] sm:$0xff] }
  0xde   : > { %1558 = vmatprep.mubr.f32.mxu1 %v593_v30  ;;  %2768 = vmatpush1.bf16.msra.mxu0 %v2767_v31  ;;  %v894_v30 = vld [vmem:[%s3798_s9 + $0x5b0] sm:$0xff]  ;;  %v897_v31 = vld [vmem:[%s3798_s9 + $0x5c8] sm:$0xff]  ;;  %v2929_v21 = vpack.c.bf16 %v927_v13, %v923_v12 }
  0xdf   : > { %2896 = vmatpush1.bf16.msra.mxu1 %v2895_v32  ;;  %2770 = vmatprep.subr.bf16.mxu0 %v2769_v33  ;;  %v901_v32 = vld [vmem:[%s3798_s9 + $0x5e8] sm:$0xff]  ;;  %v608_v33 = vld [vmem:[%s3788_s26 + $0xc0] sm:$0xff]  ;;  %v2915_v38 = vpack.c.bf16 %v894_v30, %v890_v28  ;;  %v954_v12 = vld [vmem:[%s3798_s9 + $0x790] sm:$0xff] }
  0xe0   : > { %1045 = vmatmul.mubr.f32.gmra.mrb[4].mxu0 %v592_v41  ;;  %2898 = vmatprep.subr.bf16.mxu1 %v2897_v37  ;;  %v2787_v37 = vpack.c.bf16 %v892_v27, %v888_v26  ;;  %v2789_v39 = vpack.c.bf16 %v901_v32, %v897_v31  ;;  %v931_v26 = vld [vmem:[%s3798_s9 + $0x6d8] sm:$0xff]  ;;  %v629_v28 = vld [vmem:[%s3788_s26 + $0x168] sm:$0xff]  ;;  %v928_v32 = vld [vmem:[%s3798_s9 + $0x6c0] sm:$0xff] }
  0xe1   : > { %1559 = vmatmul.mubr.f32.gmra.mrb[4].mxu1 %v592_v41  ;;  %1050 = vmatprep.mubr.f32.mxu0 %v597_v44  ;;  %v900_v41 = vld [vmem:[%s3798_s9 + $0x5e0] sm:$0xff]  ;;  %v935_v27 = vld [vmem:[%s3798_s9 + $0x6f8] sm:$0xff] }
  0xe2   : > { %1564 = vmatprep.mubr.f32.mxu1 %v597_v44  ;;  %2772 = vmatpush1.bf16.msra.mxu0 %v2771_v45  ;;  %v902_v44 = vld [vmem:[%s3798_s9 + $0x5f0] sm:$0xff]  ;;  %v905_v45 = vld [vmem:[%s3798_s9 + $0x608] sm:$0xff]  ;;  %v2933_v35 = vpack.c.bf16 %v935_v27, %v931_v26 }
  0xe3   : > { %2900 = vmatpush1.bf16.msra.mxu1 %v2899_v46  ;;  %2774 = vmatprep.subr.bf16.mxu0 %v2773_v47  ;;  %v909_v46 = vld [vmem:[%s3798_s9 + $0x628] sm:$0xff]  ;;  %v612_v47 = vld [vmem:[%s3788_s26 + $0xe0] sm:$0xff]  ;;  %v2919_v52 = vpack.c.bf16 %v902_v44, %v898_v42  ;;  %v962_v27 = vld [vmem:[%s3798_s9 + $0x7d0] sm:$0xff] }
  0xe4   : > { %1051 = vmatmul.mubr.f32.gmra.mrb[6].mxu0 %v596_v55  ;;  %2902 = vmatprep.subr.bf16.mxu1 %v2901_v51  ;;  %v2791_v51 = vpack.c.bf16 %v900_v41, %v896_v40  ;;  %v2793_v53 = vpack.c.bf16 %v909_v46, %v905_v45  ;;  %v939_v40 = vld [vmem:[%s3798_s9 + $0x718] sm:$0xff]  ;;  %v633_v42 = vld [vmem:[%s3788_s26 + $0x188] sm:$0xff]  ;;  %v936_v46 = vld [vmem:[%s3798_s9 + $0x700] sm:$0xff] }
  0xe5   : > { %1565 = vmatmul.mubr.f32.gmra.mrb[6].mxu1 %v596_v55  ;;  %1056 = vmatprep.mubr.f32.mxu0 %v601_v58  ;;  %v908_v55 = vld [vmem:[%s3798_s9 + $0x620] sm:$0xff]  ;;  %v943_v41 = vld [vmem:[%s3798_s9 + $0x738] sm:$0xff] }
  0xe6   : > { %1570 = vmatprep.mubr.f32.mxu1 %v601_v58  ;;  %2776 = vmatpush1.bf16.msra.mxu0 %v2775_v59  ;;  %v910_v58 = vld [vmem:[%s3798_s9 + $0x630] sm:$0xff]  ;;  %v913_v59 = vld [vmem:[%s3798_s9 + $0x648] sm:$0xff]  ;;  %v2937_v49 = vpack.c.bf16 %v943_v41, %v939_v40  ;;  %v664_v41 = vld [vmem:[%s3788_s26 + $0x280] sm:$0xff] }
  0xe7   : > { %2904 = vmatpush1.bf16.msra.mxu1 %v2903_v60  ;;  %2778 = vmatprep.subr.bf16.mxu0 %v2777_v61  ;;  %v917_v60 = vld [vmem:[%s3798_s9 + $0x668] sm:$0xff]  ;;  %v616_v61 = vld [vmem:[%s3788_s26 + $0x100] sm:$0xff]  ;;  %v2923_v2 = vpack.c.bf16 %v910_v58, %v906_v56 }
  0xe8   : > { %1057 = vmatmul.mubr.f32.gmra.mrb[8].mxu0 %v600_v5  ;;  %2906 = vmatprep.subr.bf16.mxu1 %v2905_v1  ;;  %v2795_v1 = vpack.c.bf16 %v908_v55, %v904_v54  ;;  %v2797_v3 = vpack.c.bf16 %v917_v60, %v913_v59  ;;  %v947_v54 = vld [vmem:[%s3798_s9 + $0x758] sm:$0xff]  ;;  %v637_v56 = vld [vmem:[%s3788_s26 + $0x1a8] sm:$0xff]  ;;  %v944_v60 = vld [vmem:[%s3798_s9 + $0x740] sm:$0xff] }
  0xe9   : > { %1571 = vmatmul.mubr.f32.gmra.mrb[8].mxu1 %v600_v5  ;;  %1062 = vmatprep.mubr.f32.mxu0 %v605_v8  ;;  %v916_v5 = vld [vmem:[%s3798_s9 + $0x660] sm:$0xff]  ;;  %v951_v55 = vld [vmem:[%s3798_s9 + $0x778] sm:$0xff]  ;;  %v665_v40 = vld [vmem:[%s3788_s26 + $0x288] sm:$0xff] }
  0xea   : > { %1576 = vmatprep.mubr.f32.mxu1 %v605_v8  ;;  %2780 = vmatpush1.bf16.msra.mxu0 %v2779_v9  ;;  %v918_v8 = vld [vmem:[%s3798_s9 + $0x670] sm:$0xff]  ;;  %v921_v9 = vld [vmem:[%s3798_s9 + $0x688] sm:$0xff]  ;;  %v2941_v63 = vpack.c.bf16 %v951_v55, %v947_v54  ;;  %v692_v55 = vld [vmem:[%s3788_s26 + $0x360] sm:$0xff] }
  0xeb   : > { %2908 = vmatpush1.bf16.msra.mxu1 %v2907_v10  ;;  %2782 = vmatprep.subr.bf16.mxu0 %v2781_v11  ;;  %v925_v10 = vld [vmem:[%s3798_s9 + $0x6a8] sm:$0xff]  ;;  %v620_v11 = vld [vmem:[%s3788_s26 + $0x120] sm:$0xff]  ;;  %v2927_v16 = vpack.c.bf16 %v918_v8, %v914_v6 }
  0xec   : > { %1063 = vmatmul.mubr.f32.gmra.mrb[10].mxu0 %v604_v19  ;;  %2910 = vmatprep.subr.bf16.mxu1 %v2909_v15  ;;  %v2799_v15 = vpack.c.bf16 %v916_v5, %v912_v4  ;;  %v2801_v17 = vpack.c.bf16 %v925_v10, %v921_v9  ;;  %v955_v4 = vld [vmem:[%s3798_s9 + $0x798] sm:$0xff]  ;;  %v641_v6 = vld [vmem:[%s3788_s26 + $0x1c8] sm:$0xff]  ;;  %v952_v10 = vld [vmem:[%s3798_s9 + $0x780] sm:$0xff] }
  0xed   : > { %1577 = vmatmul.mubr.f32.gmra.mrb[10].mxu1 %v604_v19  ;;  %1068 = vmatprep.mubr.f32.mxu0 %v609_v22  ;;  %v924_v19 = vld [vmem:[%s3798_s9 + $0x6a0] sm:$0xff]  ;;  %v959_v5 = vld [vmem:[%s3798_s9 + $0x7b8] sm:$0xff]  ;;  %v693_v54 = vld [vmem:[%s3788_s26 + $0x368] sm:$0xff] }
  0xee   : > { %1582 = vmatprep.mubr.f32.mxu1 %v609_v22  ;;  %2784 = vmatpush1.bf16.msra.mxu0 %v2783_v23  ;;  %v926_v22 = vld [vmem:[%s3798_s9 + $0x6b0] sm:$0xff]  ;;  %v929_v23 = vld [vmem:[%s3798_s9 + $0x6c8] sm:$0xff]  ;;  %v2945_v13 = vpack.c.bf16 %v959_v5, %v955_v4  ;;  %v595_v4 = vld [vmem:[%s3788_s26 + $0x58] sm:$0xff] }
  0xef   : > { %2912 = vmatpush1.bf16.msra.mxu1 %v2911_v24  ;;  %2786 = vmatprep.subr.bf16.mxu0 %v2785_v25  ;;  %v933_v24 = vld [vmem:[%s3798_s9 + $0x6e8] sm:$0xff]  ;;  %v624_v25 = vld [vmem:[%s3788_s26 + $0x140] sm:$0xff]  ;;  %v2931_v30 = vpack.c.bf16 %v926_v22, %v922_v20  ;;  %v594_v5 = vld [vmem:[%s3788_s26 + $0x50] sm:$0xff] }
  0xf0   : > { %1069 = vmatmul.mubr.f32.gmra.mrb[12].mxu0 %v608_v33  ;;  %2914 = vmatprep.subr.bf16.mxu1 %v2913_v29  ;;  %v2803_v29 = vpack.c.bf16 %v924_v19, %v920_v18  ;;  %v2805_v31 = vpack.c.bf16 %v933_v24, %v929_v23  ;;  %v963_v18 = vld [vmem:[%s3798_s9 + $0x7d8] sm:$0xff]  ;;  %v645_v20 = vld [vmem:[%s3788_s26 + $0x1e8] sm:$0xff]  ;;  %v960_v24 = vld [vmem:[%s3798_s9 + $0x7c0] sm:$0xff] }
  0xf1   : > { %1583 = vmatmul.mubr.f32.gmra.mrb[12].mxu1 %v608_v33  ;;  %1074 = vmatprep.mubr.f32.mxu0 %v613_v36  ;;  %v932_v33 = vld [vmem:[%s3798_s9 + $0x6e0] sm:$0xff]  ;;  %v967_v19 = vld [vmem:[%s3798_s9 + $0x7f8] sm:$0xff] }
  0xf2   : > { %1588 = vmatprep.mubr.f32.mxu1 %v613_v36  ;;  %2788 = vmatpush1.bf16.msra.mxu0 %v2787_v37  ;;  %v934_v36 = vld [vmem:[%s3798_s9 + $0x6f0] sm:$0xff]  ;;  %v937_v37 = vld [vmem:[%s3798_s9 + $0x708] sm:$0xff]  ;;  %v2949_v26 = vpack.c.bf16 %v967_v19, %v963_v18  ;;  %v623_v18 = vld [vmem:[%s3788_s26 + $0x138] sm:$0xff] }
  0xf3   : > { %2916 = vmatpush1.bf16.msra.mxu1 %v2915_v38  ;;  %2790 = vmatprep.subr.bf16.mxu0 %v2789_v39  ;;  %v941_v38 = vld [vmem:[%s3798_s9 + $0x728] sm:$0xff]  ;;  %v628_v39 = vld [vmem:[%s3788_s26 + $0x160] sm:$0xff]  ;;  %v2935_v44 = vpack.c.bf16 %v934_v36, %v930_v34  ;;  %v622_v19 = vld [vmem:[%s3788_s26 + $0x130] sm:$0xff] }
  0xf4   : > { %1075 = vmatmul.mubr.f32.gmra.mrb[14].mxu0 %v612_v47  ;;  %2918 = vmatprep.subr.bf16.mxu1 %v2917_v43  ;;  %v2807_v43 = vpack.c.bf16 %v932_v33, %v928_v32  ;;  %v2809_v45 = vpack.c.bf16 %v941_v38, %v937_v37  ;;  %v648_v33 = vld [vmem:[%s3788_s26 + $0x200] sm:$0xff]  ;;  %v653_v34 = vld [vmem:[%s3788_s26 + $0x228] sm:$0xff] }
  0xf5   : > { %1589 = vmatmul.mubr.f32.gmra.mrb[14].mxu1 %v612_v47  ;;  %1080 = vmatprep.mubr.f32.mxu0 %v617_v50  ;;  %v940_v47 = vld [vmem:[%s3798_s9 + $0x720] sm:$0xff]  ;;  %v657_v36 = vld [vmem:[%s3788_s26 + $0x248] sm:$0xff] }
  0xf6   : > { %1594 = vmatprep.mubr.f32.mxu1 %v617_v50  ;;  %2792 = vmatpush1.bf16.msra.mxu0 %v2791_v51  ;;  %v942_v50 = vld [vmem:[%s3798_s9 + $0x730] sm:$0xff]  ;;  %v945_v51 = vld [vmem:[%s3798_s9 + $0x748] sm:$0xff]  ;;  %v656_v37 = vld [vmem:[%s3788_s26 + $0x240] sm:$0xff] }
  0xf7   : > { %2920 = vmatpush1.bf16.msra.mxu1 %v2919_v52  ;;  %2794 = vmatprep.subr.bf16.mxu0 %v2793_v53  ;;  %v949_v52 = vld [vmem:[%s3798_s9 + $0x768] sm:$0xff]  ;;  %v632_v53 = vld [vmem:[%s3788_s26 + $0x180] sm:$0xff]  ;;  %v2939_v58 = vpack.c.bf16 %v942_v50, %v938_v48 }
  0xf8   : > { %1081 = vmatmul.mubr.f32.gmra.mrb[16].mxu0 %v616_v61  ;;  %2922 = vmatprep.subr.bf16.mxu1 %v2921_v57  ;;  %v2811_v57 = vpack.c.bf16 %v940_v47, %v936_v46  ;;  %v2813_v59 = vpack.c.bf16 %v949_v52, %v945_v51  ;;  %v661_v38 = vld [vmem:[%s3788_s26 + $0x268] sm:$0xff]  ;;  %v676_v47 = vld [vmem:[%s3788_s26 + $0x2e0] sm:$0xff] }
  0xf9   : > { %1595 = vmatmul.mubr.f32.gmra.mrb[16].mxu1 %v616_v61  ;;  %1086 = vmatprep.mubr.f32.mxu0 %v621_v0  ;;  %v948_v61 = vld [vmem:[%s3798_s9 + $0x760] sm:$0xff]  ;;  %v677_v46 = vld [vmem:[%s3788_s26 + $0x2e8] sm:$0xff] }
  0xfa   : > { %1600 = vmatprep.mubr.f32.mxu1 %v621_v0  ;;  %2796 = vmatpush1.bf16.msra.mxu0 %v2795_v1  ;;  %v950_v0 = vld [vmem:[%s3798_s9 + $0x770] sm:$0xff]  ;;  %v953_v1 = vld [vmem:[%s3798_s9 + $0x788] sm:$0xff]  ;;  %v684_v51 = vld [vmem:[%s3788_s26 + $0x320] sm:$0xff] }
  0xfb   : > { %2924 = vmatpush1.bf16.msra.mxu1 %v2923_v2  ;;  %2798 = vmatprep.subr.bf16.mxu0 %v2797_v3  ;;  %v957_v2 = vld [vmem:[%s3798_s9 + $0x7a8] sm:$0xff]  ;;  %v636_v3 = vld [vmem:[%s3788_s26 + $0x1a0] sm:$0xff]  ;;  %v2943_v8 = vpack.c.bf16 %v950_v0, %v946_v62  ;;  %v587_v0 = vld [vmem:[%s3788_s26 + $0x18] sm:$0xff] }
  0xfc   : > { %1087 = vmatmul.mubr.f32.gmra.mrb[18].mxu0 %v620_v11  ;;  %2926 = vmatprep.subr.bf16.mxu1 %v2925_v7  ;;  %v2815_v7 = vpack.c.bf16 %v948_v61, %v944_v60  ;;  %v2817_v9 = vpack.c.bf16 %v957_v2, %v953_v1  ;;  %v681_v48 = vld [vmem:[%s3788_s26 + $0x308] sm:$0xff]  ;;  %v704_v61 = vld [vmem:[%s3788_s26 + $0x3c0] sm:$0xff]  ;;  %v586_v1 = vld [vmem:[%s3788_s26 + $0x10] sm:$0xff] }
  0xfd   : > { %1601 = vmatmul.mubr.f32.gmra.mrb[18].mxu1 %v620_v11  ;;  %1092 = vmatprep.mubr.f32.mxu0 %v625_v14  ;;  %v956_v11 = vld [vmem:[%s3798_s9 + $0x7a0] sm:$0xff]  ;;  %v685_v50 = vld [vmem:[%s3788_s26 + $0x328] sm:$0xff]  ;;  %v591_v2 = vld [vmem:[%s3788_s26 + $0x38] sm:$0xff] }
  0xfe   : > { %1606 = vmatprep.mubr.f32.mxu1 %v625_v14  ;;  %2800 = vmatpush1.bf16.msra.mxu0 %v2799_v15  ;;  %v958_v14 = vld [vmem:[%s3798_s9 + $0x7b0] sm:$0xff]  ;;  %v961_v15 = vld [vmem:[%s3798_s9 + $0x7c8] sm:$0xff] }
  0xff   : > { %2928 = vmatpush1.bf16.msra.mxu1 %v2927_v16  ;;  %2802 = vmatprep.subr.bf16.mxu0 %v2801_v17  ;;  %v965_v16 = vld [vmem:[%s3798_s9 + $0x7e8] sm:$0xff]  ;;  %v640_v17 = vld [vmem:[%s3788_s26 + $0x1c0] sm:$0xff]  ;;  %v2947_v22 = vpack.c.bf16 %v958_v14, %v954_v12  ;;  %v611_v12 = vld [vmem:[%s3788_s26 + $0xd8] sm:$0xff] }
 0x100   : > { %1093 = vmatmul.mubr.f32.gmra.mrb[20].mxu0 %v624_v25  ;;  %2930 = vmatprep.subr.bf16.mxu1 %v2929_v21  ;;  %v2819_v21 = vpack.c.bf16 %v956_v11, %v952_v10  ;;  %v2821_v23 = vpack.c.bf16 %v965_v16, %v961_v15  ;;  %v689_v52 = vld [vmem:[%s3788_s26 + $0x348] sm:$0xff]  ;;  %v607_v10 = vld [vmem:[%s3788_s26 + $0xb8] sm:$0xff]  ;;  %v606_v11 = vld [vmem:[%s3788_s26 + $0xb0] sm:$0xff] }
 0x101   : > { %1607 = vmatmul.mubr.f32.gmra.mrb[20].mxu1 %v624_v25  ;;  %1098 = vmatprep.mubr.f32.mxu0 %v629_v28  ;;  %v964_v25 = vld [vmem:[%s3798_s9 + $0x7e0] sm:$0xff]  ;;  %v705_v60 = vld [vmem:[%s3788_s26 + $0x3c8] sm:$0xff]  ;;  %v615_v14 = vld [vmem:[%s3788_s26 + $0xf8] sm:$0xff] }
 0x102   : > { %1612 = vmatprep.mubr.f32.mxu1 %v629_v28  ;;  %2804 = vmatpush1.bf16.msra.mxu0 %v2803_v29  ;;  %v966_v28 = vld [vmem:[%s3798_s9 + $0x7f0] sm:$0xff]  ;;  %v644_v29 = vld [vmem:[%s3788_s26 + $0x1e0] sm:$0xff]  ;;  %v709_v62 = vld [vmem:[%s3788_s26 + $0x3e8] sm:$0xff]  ;;  %s3320_s9 = scalar_lea.vmem %s3319_s18, 32768 }
 0x103   : > { %2932 = vmatpush1.bf16.msra.mxu1 %v2931_v30  ;;  %2806 = vmatprep.subr.bf16.mxu0 %v2805_v31  ;;  %v649_v30 = vld [vmem:[%s3788_s26 + $0x208] sm:$0xff]  ;;  %v2823_v31 = vpack.c.bf16 %v964_v25, %v960_v24  ;;  %v2951_v32 = vpack.c.bf16 %v966_v28, %v962_v27  ;;  %v614_v15 = vld [vmem:[%s3788_s26 + $0xf0] sm:$0xff]  ;;  %v619_v16 = vld [vmem:[%s3788_s26 + $0x118] sm:$0xff]  ;;  %p3322_p9 = scmp.lt.s32.totalorder %s3320_s9, %s3314_s11 }
 0x104   : > { %1099 = vmatmul.mubr.f32.gmra.mrb[22].mxu0 %v628_v39  ;;  %2934 = vmatprep.subr.bf16.mxu1 %v2933_v35  ;;  %v652_v35 = vld [vmem:[%s3788_s26 + $0x220] sm:$0xff]  ;;  %v635_v24 = vld [vmem:[%s3788_s26 + $0x198] sm:$0xff]  ;;  %v634_v25 = vld [vmem:[%s3788_s26 + $0x190] sm:$0xff] }
 0x105   : > { %1613 = vmatmul.mubr.f32.gmra.mrb[22].mxu1 %v628_v39  ;;  %1104 = vmatprep.mubr.f32.mxu0 %v633_v42  ;;  %v660_v39 = vld [vmem:[%s3788_s26 + $0x260] sm:$0xff]  ;;  %v638_v27 = vld [vmem:[%s3788_s26 + $0x1b0] sm:$0xff]  ;;  %v643_v28 = vld [vmem:[%s3788_s26 + $0x1d8] sm:$0xff]  ;;  %p3323_p4 = por %p3322_p9, %p3321_p3 }
 0x106   : > { %1618 = vmatprep.mubr.f32.mxu1 %v633_v42  ;;  %2808 = vmatpush1.bf16.msra.mxu0 %v2807_v43  ;;  %v669_v42 = vld [vmem:[%s3788_s26 + $0x2a8] sm:$0xff]  ;;  %v668_v43 = vld [vmem:[%s3788_s26 + $0x2a0] sm:$0xff] }
 0x107   : > { %2936 = vmatpush1.bf16.msra.mxu1 %v2935_v44  ;;  %2810 = vmatprep.subr.bf16.mxu0 %v2809_v45  ;;  %v673_v44 = vld [vmem:[%s3788_s26 + $0x2c8] sm:$0xff]  ;;  %v672_v45 = vld [vmem:[%s3788_s26 + $0x2c0] sm:$0xff]  ;;  %p3324_p1 = pnand %p3323_p4, %p3317_p2 }
 0x108   : > { %1105 = vmatmul.mubr.f32.gmra.mrb[24].mxu0 %v632_v53  ;;  %2938 = vmatprep.subr.bf16.mxu1 %v2937_v49  ;;  %v680_v49 = vld [vmem:[%s3788_s26 + $0x300] sm:$0xff] }
 0x109   : > { %1619 = vmatmul.mubr.f32.gmra.mrb[24].mxu1 %v632_v53  ;;  %1110 = vmatprep.mubr.f32.mxu0 %v637_v56  ;;  %v688_v53 = vld [vmem:[%s3788_s26 + $0x340] sm:$0xff] }
 0x10a   : > { %1624 = vmatprep.mubr.f32.mxu1 %v637_v56  ;;  %2812 = vmatpush1.bf16.msra.mxu0 %v2811_v57  ;;  %v697_v56 = vld [vmem:[%s3788_s26 + $0x388] sm:$0xff]  ;;  %v696_v57 = vld [vmem:[%s3788_s26 + $0x380] sm:$0xff] }
 0x10b   : > { %2940 = vmatpush1.bf16.msra.mxu1 %v2939_v58  ;;  %2814 = vmatprep.subr.bf16.mxu0 %v2813_v59  ;;  %v701_v58 = vld [vmem:[%s3788_s26 + $0x3a8] sm:$0xff]  ;;  %v700_v59 = vld [vmem:[%s3788_s26 + $0x3a0] sm:$0xff] }
 0x10c   : > { %1111 = vmatmul.mubr.f32.gmra.mrb[26].mxu0 %v636_v3  ;;  %2942 = vmatprep.subr.bf16.mxu1 %v2941_v63  ;;  %v708_v63 = vld [vmem:[%s3788_s26 + $0x3e0] sm:$0xff] }
 0x10d   : > { %1625 = vmatmul.mubr.f32.gmra.mrb[26].mxu1 %v636_v3  ;;  %1116 = vmatprep.mubr.f32.mxu0 %v641_v6  ;;  %v590_v3 = vld [vmem:[%s3788_s26 + $0x30] sm:$0xff] }
 0x10e   : > { %1630 = vmatprep.mubr.f32.mxu1 %v641_v6  ;;  %2816 = vmatpush1.bf16.msra.mxu0 %v2815_v7  ;;  %v599_v6 = vld [vmem:[%s3788_s26 + $0x78] sm:$0xff]  ;;  %v598_v7 = vld [vmem:[%s3788_s26 + $0x70] sm:$0xff] }
 0x10f   : > { %2944 = vmatpush1.bf16.msra.mxu1 %v2943_v8  ;;  %2818 = vmatprep.subr.bf16.mxu0 %v2817_v9  ;;  %v603_v8 = vld [vmem:[%s3788_s26 + $0x98] sm:$0xff]  ;;  %v602_v9 = vld [vmem:[%s3788_s26 + $0x90] sm:$0xff] }
 0x110   : > { %1117 = vmatmul.mubr.f32.gmra.mrb[28].mxu0 %v640_v17  ;;  %2946 = vmatprep.subr.bf16.mxu1 %v2945_v13  ;;  %v610_v13 = vld [vmem:[%s3788_s26 + $0xd0] sm:$0xff] }
 0x111   : > { %1631 = vmatmul.mubr.f32.gmra.mrb[28].mxu1 %v640_v17  ;;  %1122 = vmatprep.mubr.f32.mxu0 %v645_v20  ;;  %v618_v17 = vld [vmem:[%s3788_s26 + $0x110] sm:$0xff] }
 0x112   : > { %1636 = vmatprep.mubr.f32.mxu1 %v645_v20  ;;  %2820 = vmatpush1.bf16.msra.mxu0 %v2819_v21  ;;  %v627_v20 = vld [vmem:[%s3788_s26 + $0x158] sm:$0xff]  ;;  %v626_v21 = vld [vmem:[%s3788_s26 + $0x150] sm:$0xff] }
 0x113   : > { %2948 = vmatpush1.bf16.msra.mxu1 %v2947_v22  ;;  %2822 = vmatprep.subr.bf16.mxu0 %v2821_v23  ;;  %v631_v22 = vld [vmem:[%s3788_s26 + $0x178] sm:$0xff]  ;;  %v630_v23 = vld [vmem:[%s3788_s26 + $0x170] sm:$0xff] }
 0x114   : > { %1123 = vmatmul.mubr.f32.gmra.mrb[30].mxu0 %v644_v29  ;;  %2950 = vmatprep.subr.bf16.mxu1 %v2949_v26  ;;  %v639_v26 = vld [vmem:[%s3788_s26 + $0x1b8] sm:$0xff] }
 0x115   : > { %1637 = vmatmul.mubr.f32.gmra.mrb[30].mxu1 %v644_v29  ;;  %1128 = vmatprep.mubr.f32.mxu0 %v649_v30  ;;  %v642_v29 = vld [vmem:[%s3788_s26 + $0x1d0] sm:$0xff] }
 0x116   : > { %1642 = vmatprep.mubr.f32.mxu1 %v649_v30  ;;  %2824 = vmatpush1.bf16.msra.mxu0 %v2823_v31  ;;  %v647_v30 = vld [vmem:[%s3788_s26 + $0x1f8] sm:$0xff]  ;;  %v646_v31 = vld [vmem:[%s3788_s26 + $0x1f0] sm:$0xff] }
 0x117   : > { %2952 = vmatpush1.bf16.msra.mxu1 %v2951_v32  ;;  %v651_v32 = vld [vmem:[%s3788_s26 + $0x218] sm:$0xff] }
 0x118   : > { %1129 = vmatmul.mubr.f32.gmra.mrb[32].mxu0 %v648_v33 }
 0x119   : > { %1643 = vmatmul.mubr.f32.gmra.mrb[32].mxu1 %v648_v33  ;;  %1134 = vmatprep.mubr.f32.mxu0 %v653_v34  ;;  %v650_v33 = vld [vmem:[%s3788_s26 + $0x210] sm:$0xff] }
 0x11a   : > { %1648 = vmatprep.mubr.f32.mxu1 %v653_v34  ;;  %v655_v34 = vld [vmem:[%s3788_s26 + $0x238] sm:$0xff] }
 0x11c   : > { %1135 = vmatmul.mubr.f32.gmra.mrb[34].mxu0 %v652_v35 }
 0x11d   : > { %1649 = vmatmul.mubr.f32.gmra.mrb[34].mxu1 %v652_v35  ;;  %1140 = vmatprep.mubr.f32.mxu0 %v657_v36  ;;  %v654_v35 = vld [vmem:[%s3788_s26 + $0x230] sm:$0xff] }
 0x11e   : > { %1654 = vmatprep.mubr.f32.mxu1 %v657_v36  ;;  %v659_v36 = vld [vmem:[%s3788_s26 + $0x258] sm:$0xff] }
 0x120   : > { %1141 = vmatmul.mubr.f32.gmra.mrb[36].mxu0 %v656_v37 }
 0x121   : > { %1655 = vmatmul.mubr.f32.gmra.mrb[36].mxu1 %v656_v37  ;;  %1146 = vmatprep.mubr.f32.mxu0 %v661_v38  ;;  %v658_v37 = vld [vmem:[%s3788_s26 + $0x250] sm:$0xff] }
 0x122   : > { %1660 = vmatprep.mubr.f32.mxu1 %v661_v38  ;;  %v663_v38 = vld [vmem:[%s3788_s26 + $0x278] sm:$0xff] }
 0x124   : > { %1147 = vmatmul.mubr.f32.gmra.mrb[38].mxu0 %v660_v39 }
 0x125   : > { %1661 = vmatmul.mubr.f32.gmra.mrb[38].mxu1 %v660_v39  ;;  %1152 = vmatprep.mubr.f32.mxu0 %v665_v40  ;;  %v662_v39 = vld [vmem:[%s3788_s26 + $0x270] sm:$0xff] }
 0x126   : > { %1666 = vmatprep.mubr.f32.mxu1 %v665_v40  ;;  %v667_v40 = vld [vmem:[%s3788_s26 + $0x298] sm:$0xff] }
 0x128   : > { %1153 = vmatmul.mubr.f32.gmra.mrb[40].mxu0 %v664_v41 }
 0x129   : > { %1667 = vmatmul.mubr.f32.gmra.mrb[40].mxu1 %v664_v41  ;;  %1158 = vmatprep.mubr.f32.mxu0 %v669_v42  ;;  %v666_v41 = vld [vmem:[%s3788_s26 + $0x290] sm:$0xff] }
 0x12a   : > { %1672 = vmatprep.mubr.f32.mxu1 %v669_v42  ;;  %v671_v42 = vld [vmem:[%s3788_s26 + $0x2b8] sm:$0xff] }
 0x12c   : > { %1159 = vmatmul.mubr.f32.gmra.mrb[42].mxu0 %v668_v43 }
 0x12d   : > { %1673 = vmatmul.mubr.f32.gmra.mrb[42].mxu1 %v668_v43  ;;  %1164 = vmatprep.mubr.f32.mxu0 %v673_v44  ;;  %v670_v43 = vld [vmem:[%s3788_s26 + $0x2b0] sm:$0xff] }
 0x12e   : > { %1678 = vmatprep.mubr.f32.mxu1 %v673_v44  ;;  %v675_v44 = vld [vmem:[%s3788_s26 + $0x2d8] sm:$0xff] }
 0x130   : > { %1165 = vmatmul.mubr.f32.gmra.mrb[44].mxu0 %v672_v45 }
 0x131   : > { %1679 = vmatmul.mubr.f32.gmra.mrb[44].mxu1 %v672_v45  ;;  %1170 = vmatprep.mubr.f32.mxu0 %v677_v46  ;;  %v674_v45 = vld [vmem:[%s3788_s26 + $0x2d0] sm:$0xff] }
 0x132   : > { %1684 = vmatprep.mubr.f32.mxu1 %v677_v46  ;;  %v679_v46 = vld [vmem:[%s3788_s26 + $0x2f8] sm:$0xff] }
 0x134   : > { %1171 = vmatmul.mubr.f32.gmra.mrb[46].mxu0 %v676_v47 }
 0x135   : > { %1685 = vmatmul.mubr.f32.gmra.mrb[46].mxu1 %v676_v47  ;;  %1176 = vmatprep.mubr.f32.mxu0 %v681_v48  ;;  %v678_v47 = vld [vmem:[%s3788_s26 + $0x2f0] sm:$0xff] }
 0x136   : > { %1690 = vmatprep.mubr.f32.mxu1 %v681_v48  ;;  %v683_v48 = vld [vmem:[%s3788_s26 + $0x318] sm:$0xff] }
 0x138   : > { %1177 = vmatmul.mubr.f32.gmra.mrb[48].mxu0 %v680_v49 }
 0x139   : > { %1691 = vmatmul.mubr.f32.gmra.mrb[48].mxu1 %v680_v49  ;;  %1182 = vmatprep.mubr.f32.mxu0 %v685_v50  ;;  %v682_v49 = vld [vmem:[%s3788_s26 + $0x310] sm:$0xff] }
 0x13a   : > { %1696 = vmatprep.mubr.f32.mxu1 %v685_v50  ;;  %v687_v50 = vld [vmem:[%s3788_s26 + $0x338] sm:$0xff] }
 0x13c   : > { %1183 = vmatmul.mubr.f32.gmra.mrb[50].mxu0 %v684_v51 }
 0x13d   : > { %1697 = vmatmul.mubr.f32.gmra.mrb[50].mxu1 %v684_v51  ;;  %1188 = vmatprep.mubr.f32.mxu0 %v689_v52  ;;  %v686_v51 = vld [vmem:[%s3788_s26 + $0x330] sm:$0xff] }
 0x13e   : > { %1702 = vmatprep.mubr.f32.mxu1 %v689_v52  ;;  %v691_v52 = vld [vmem:[%s3788_s26 + $0x358] sm:$0xff] }
 0x140   : > { %1189 = vmatmul.mubr.f32.gmra.mrb[52].mxu0 %v688_v53 }
 0x141   : > { %1703 = vmatmul.mubr.f32.gmra.mrb[52].mxu1 %v688_v53  ;;  %1194 = vmatprep.mubr.f32.mxu0 %v693_v54  ;;  %v690_v53 = vld [vmem:[%s3788_s26 + $0x350] sm:$0xff] }
 0x142   : > { %1708 = vmatprep.mubr.f32.mxu1 %v693_v54  ;;  %v695_v54 = vld [vmem:[%s3788_s26 + $0x378] sm:$0xff] }
 0x144   : > { %1195 = vmatmul.mubr.f32.gmra.mrb[54].mxu0 %v692_v55 }
 0x145   : > { %1709 = vmatmul.mubr.f32.gmra.mrb[54].mxu1 %v692_v55  ;;  %1200 = vmatprep.mubr.f32.mxu0 %v697_v56  ;;  %v694_v55 = vld [vmem:[%s3788_s26 + $0x370] sm:$0xff] }
 0x146   : > { %1714 = vmatprep.mubr.f32.mxu1 %v697_v56  ;;  %v699_v56 = vld [vmem:[%s3788_s26 + $0x398] sm:$0xff] }
 0x148   : > { %1201 = vmatmul.mubr.f32.gmra.mrb[56].mxu0 %v696_v57 }
 0x149   : > { %1715 = vmatmul.mubr.f32.gmra.mrb[56].mxu1 %v696_v57  ;;  %1206 = vmatprep.mubr.f32.mxu0 %v701_v58  ;;  %v698_v57 = vld [vmem:[%s3788_s26 + $0x390] sm:$0xff] }
 0x14a   : > { %1720 = vmatprep.mubr.f32.mxu1 %v701_v58  ;;  %v703_v58 = vld [vmem:[%s3788_s26 + $0x3b8] sm:$0xff] }
 0x14c   : > { %1207 = vmatmul.mubr.f32.gmra.mrb[58].mxu0 %v700_v59 }
 0x14d   : > { %1721 = vmatmul.mubr.f32.gmra.mrb[58].mxu1 %v700_v59  ;;  %1212 = vmatprep.mubr.f32.mxu0 %v705_v60  ;;  %v702_v59 = vld [vmem:[%s3788_s26 + $0x3b0] sm:$0xff] }
 0x14e   : > { %1726 = vmatprep.mubr.f32.mxu1 %v705_v60  ;;  %v707_v60 = vld [vmem:[%s3788_s26 + $0x3d8] sm:$0xff] }
 0x150   : > { %1213 = vmatmul.mubr.f32.gmra.mrb[60].mxu0 %v704_v61 }
 0x151   : > { %1727 = vmatmul.mubr.f32.gmra.mrb[60].mxu1 %v704_v61  ;;  %1218 = vmatprep.mubr.f32.mxu0 %v709_v62  ;;  %v706_v61 = vld [vmem:[%s3788_s26 + $0x3d0] sm:$0xff] }
 0x152   : > { %1732 = vmatprep.mubr.f32.mxu1 %v709_v62  ;;  %v711_v62 = vld [vmem:[%s3788_s26 + $0x3f8] sm:$0xff] }
 0x154   : > { %1219 = vmatmul.mubr.f32.gmra.mrb[62].mxu0 %v708_v63 }
 0x155   : > { %1733 = vmatmul.mubr.f32.gmra.mrb[62].mxu1 %v708_v63  ;;  %1289 = vmatprep.mubr.f32.mxu0 %v587_v0  ;;  %v710_v63 = vld [vmem:[%s3788_s26 + $0x3f0] sm:$0xff]  ;;  %s4608_s26 = smov %s4607_s23 }
 0x156   : > { %1803 = vmatprep.mubr.f32.mxu1 %v587_v0  ;;  %v308_v0 = vlaneseq }
 0x158   : > { %1290 = vmatmul.mubr.f32.vlgmr.msra.gmra.mrb[0].mxu0 %v586_v1 }
 0x159   : > { %1804 = vmatmul.mubr.f32.vlgmr.msra.gmra.mrb[0].mxu1 %v586_v1  ;;  %1295 = vmatprep.mubr.f32.mxu0 %v591_v2  ;;  %v309_v1 = vshrl.u32 %v308_v0, 7 }
 0x15a   : > { %1809 = vmatprep.mubr.f32.mxu1 %v591_v2 }
 0x15b   : > { %v310_v2 = vsub.s32 0, %v309_v1 }
 0x15c   : > { %1296 = vmatmul.mubr.f32.gmra.mrb[2].mxu0 %v590_v3 }
 0x15d   : > { %1810 = vmatmul.mubr.f32.gmra.mrb[2].mxu1 %v590_v3  ;;  %1301 = vmatprep.mubr.f32.mxu0 %v595_v4  ;;  %v306_v3 = vld [vmem:[%s262_s27] sm:$0xf] }
 0x15e   : > { %1815 = vmatprep.mubr.f32.mxu1 %v595_v4  ;;  %v318_v4 = vsub.s32 2, %v309_v1 }
 0x160   : > { %1302 = vmatmul.mubr.f32.gmra.mrb[4].mxu0 %v594_v5 }
 0x161   : > { %1816 = vmatmul.mubr.f32.gmra.mrb[4].mxu1 %v594_v5  ;;  %1307 = vmatprep.mubr.f32.mxu0 %v599_v6  ;;  %v314_v5 = vsub.s32 1, %v309_v1 }
 0x162   : > { %1821 = vmatprep.mubr.f32.mxu1 %v599_v6  ;;  %v322_v6 = vsub.s32 3, %v309_v1 }
 0x164   : > { %1308 = vmatmul.mubr.f32.gmra.mrb[6].mxu0 %v598_v7 }
 0x165   : > { %1822 = vmatmul.mubr.f32.gmra.mrb[6].mxu1 %v598_v7  ;;  %1313 = vmatprep.mubr.f32.mxu0 %v603_v8  ;;  %v4193_v7 = vrot.slane %v306_v3, %v310_v2 }
 0x166   : > { %1827 = vmatprep.mubr.f32.mxu1 %v603_v8  ;;  %v4195_v8 = vrot.slane %v306_v3, %v318_v4 }
 0x168   : > { %1314 = vmatmul.mubr.f32.gmra.mrb[8].mxu0 %v602_v9 }
 0x169   : > { %1828 = vmatmul.mubr.f32.gmra.mrb[8].mxu1 %v602_v9  ;;  %1319 = vmatprep.mubr.f32.mxu0 %v607_v10  ;;  %v4197_v9 = vrot.slane %v306_v3, %v314_v5 }
 0x16a   : > { %1833 = vmatprep.mubr.f32.mxu1 %v607_v10  ;;  %v4199_v10 = vrot.slane %v306_v3, %v322_v6 }
 0x16c   : > { %1320 = vmatmul.mubr.f32.gmra.mrb[10].mxu0 %v606_v11 }
 0x16d   : > { %1834 = vmatmul.mubr.f32.gmra.mrb[10].mxu1 %v606_v11  ;;  %1325 = vmatprep.mubr.f32.mxu0 %v611_v12 }
 0x16e   : > { %1839 = vmatprep.mubr.f32.mxu1 %v611_v12 }
 0x170   : > { %1326 = vmatmul.mubr.f32.gmra.mrb[12].mxu0 %v610_v13 }
 0x171   : > { %1840 = vmatmul.mubr.f32.gmra.mrb[12].mxu1 %v610_v13  ;;  %1331 = vmatprep.mubr.f32.mxu0 %v615_v14 }
 0x172   : > { %1845 = vmatprep.mubr.f32.mxu1 %v615_v14 }
 0x174   : > { %1332 = vmatmul.mubr.f32.gmra.mrb[14].mxu0 %v614_v15 }
 0x175   : > { %1846 = vmatmul.mubr.f32.gmra.mrb[14].mxu1 %v614_v15  ;;  %1337 = vmatprep.mubr.f32.mxu0 %v619_v16 }
 0x176   : > { %1851 = vmatprep.mubr.f32.mxu1 %v619_v16 }
 0x178   : > { %1338 = vmatmul.mubr.f32.gmra.mrb[16].mxu0 %v618_v17 }
 0x179   : > { %1852 = vmatmul.mubr.f32.gmra.mrb[16].mxu1 %v618_v17  ;;  %1343 = vmatprep.mubr.f32.mxu0 %v623_v18 }
 0x17a   : > { %1857 = vmatprep.mubr.f32.mxu1 %v623_v18 }
 0x17c   : > { %1344 = vmatmul.mubr.f32.gmra.mrb[18].mxu0 %v622_v19 }
 0x17d   : > { %1858 = vmatmul.mubr.f32.gmra.mrb[18].mxu1 %v622_v19  ;;  %1349 = vmatprep.mubr.f32.mxu0 %v627_v20 }
 0x17e   : > { %1863 = vmatprep.mubr.f32.mxu1 %v627_v20 }
 0x180   : > { %1350 = vmatmul.mubr.f32.gmra.mrb[20].mxu0 %v626_v21 }
 0x181   : > { %1864 = vmatmul.mubr.f32.gmra.mrb[20].mxu1 %v626_v21  ;;  %1355 = vmatprep.mubr.f32.mxu0 %v631_v22 }
 0x182   : > { %1869 = vmatprep.mubr.f32.mxu1 %v631_v22 }
 0x184   : > { %1356 = vmatmul.mubr.f32.gmra.mrb[22].mxu0 %v630_v23 }
 0x185   : > { %1870 = vmatmul.mubr.f32.gmra.mrb[22].mxu1 %v630_v23  ;;  %1361 = vmatprep.mubr.f32.mxu0 %v635_v24 }
 0x186   : > { %1875 = vmatprep.mubr.f32.mxu1 %v635_v24 }
 0x188   : > { %1362 = vmatmul.mubr.f32.gmra.mrb[24].mxu0 %v634_v25 }
 0x189   : > { %1876 = vmatmul.mubr.f32.gmra.mrb[24].mxu1 %v634_v25  ;;  %1367 = vmatprep.mubr.f32.mxu0 %v639_v26 }
 0x18a   : > { %1881 = vmatprep.mubr.f32.mxu1 %v639_v26 }
 0x18c   : > { %1368 = vmatmul.mubr.f32.gmra.mrb[26].mxu0 %v638_v27 }
 0x18d   : > { %1882 = vmatmul.mubr.f32.gmra.mrb[26].mxu1 %v638_v27  ;;  %1373 = vmatprep.mubr.f32.mxu0 %v643_v28 }
 0x18e   : > { %1887 = vmatprep.mubr.f32.mxu1 %v643_v28 }
 0x190   : > { %1374 = vmatmul.mubr.f32.gmra.mrb[28].mxu0 %v642_v29 }
 0x191   : > { %1888 = vmatmul.mubr.f32.gmra.mrb[28].mxu1 %v642_v29  ;;  %1379 = vmatprep.mubr.f32.mxu0 %v647_v30 }
 0x192   : > { %1893 = vmatprep.mubr.f32.mxu1 %v647_v30 }
 0x194   : > { %1380 = vmatmul.mubr.f32.gmra.mrb[30].mxu0 %v646_v31 }
 0x195   : > { %1894 = vmatmul.mubr.f32.gmra.mrb[30].mxu1 %v646_v31  ;;  %1385 = vmatprep.mubr.f32.mxu0 %v651_v32 }
 0x196   : > { %1899 = vmatprep.mubr.f32.mxu1 %v651_v32 }
 0x198   : > { %1386 = vmatmul.mubr.f32.gmra.mrb[32].mxu0 %v650_v33 }
 0x199   : > { %1900 = vmatmul.mubr.f32.gmra.mrb[32].mxu1 %v650_v33  ;;  %1391 = vmatprep.mubr.f32.mxu0 %v655_v34 }
 0x19a   : > { %1905 = vmatprep.mubr.f32.mxu1 %v655_v34 }
 0x19c   : > { %1392 = vmatmul.mubr.f32.gmra.mrb[34].mxu0 %v654_v35 }
 0x19d   : > { %1906 = vmatmul.mubr.f32.gmra.mrb[34].mxu1 %v654_v35  ;;  %1397 = vmatprep.mubr.f32.mxu0 %v659_v36 }
 0x19e   : > { %1911 = vmatprep.mubr.f32.mxu1 %v659_v36 }
 0x1a0   : > { %1398 = vmatmul.mubr.f32.gmra.mrb[36].mxu0 %v658_v37 }
 0x1a1   : > { %1912 = vmatmul.mubr.f32.gmra.mrb[36].mxu1 %v658_v37  ;;  %1403 = vmatprep.mubr.f32.mxu0 %v663_v38 }
 0x1a2   : > { %1917 = vmatprep.mubr.f32.mxu1 %v663_v38 }
 0x1a4   : > { %1404 = vmatmul.mubr.f32.gmra.mrb[38].mxu0 %v662_v39 }
 0x1a5   : > { %1918 = vmatmul.mubr.f32.gmra.mrb[38].mxu1 %v662_v39  ;;  %1409 = vmatprep.mubr.f32.mxu0 %v667_v40 }
 0x1a6   : > { %1923 = vmatprep.mubr.f32.mxu1 %v667_v40 }
 0x1a8   : > { %1410 = vmatmul.mubr.f32.gmra.mrb[40].mxu0 %v666_v41 }
 0x1a9   : > { %1924 = vmatmul.mubr.f32.gmra.mrb[40].mxu1 %v666_v41  ;;  %1415 = vmatprep.mubr.f32.mxu0 %v671_v42 }
 0x1aa   : > { %1929 = vmatprep.mubr.f32.mxu1 %v671_v42 }
 0x1ac   : > { %1416 = vmatmul.mubr.f32.gmra.mrb[42].mxu0 %v670_v43 }
 0x1ad   : > { %1930 = vmatmul.mubr.f32.gmra.mrb[42].mxu1 %v670_v43  ;;  %1421 = vmatprep.mubr.f32.mxu0 %v675_v44 }
 0x1ae   : > { %1935 = vmatprep.mubr.f32.mxu1 %v675_v44 }
 0x1b0   : > { %1422 = vmatmul.mubr.f32.gmra.mrb[44].mxu0 %v674_v45 }
 0x1b1   : > { %1936 = vmatmul.mubr.f32.gmra.mrb[44].mxu1 %v674_v45  ;;  %1427 = vmatprep.mubr.f32.mxu0 %v679_v46 }
 0x1b2   : > { %1941 = vmatprep.mubr.f32.mxu1 %v679_v46 }
 0x1b4   : > { %1428 = vmatmul.mubr.f32.gmra.mrb[46].mxu0 %v678_v47 }
 0x1b5   : > { %1942 = vmatmul.mubr.f32.gmra.mrb[46].mxu1 %v678_v47  ;;  %1433 = vmatprep.mubr.f32.mxu0 %v683_v48 }
 0x1b6   : > { %1947 = vmatprep.mubr.f32.mxu1 %v683_v48 }
 0x1b8   : > { %1434 = vmatmul.mubr.f32.gmra.mrb[48].mxu0 %v682_v49 }
 0x1b9   : > { %1948 = vmatmul.mubr.f32.gmra.mrb[48].mxu1 %v682_v49  ;;  %1439 = vmatprep.mubr.f32.mxu0 %v687_v50 }
 0x1ba   : > { %1953 = vmatprep.mubr.f32.mxu1 %v687_v50 }
 0x1bc   : > { %1440 = vmatmul.mubr.f32.gmra.mrb[50].mxu0 %v686_v51 }
 0x1bd   : > { %1954 = vmatmul.mubr.f32.gmra.mrb[50].mxu1 %v686_v51  ;;  %1445 = vmatprep.mubr.f32.mxu0 %v691_v52 }
 0x1be   : > { %1959 = vmatprep.mubr.f32.mxu1 %v691_v52 }
 0x1c0   : > { %1446 = vmatmul.mubr.f32.gmra.mrb[52].mxu0 %v690_v53 }
 0x1c1   : > { %1960 = vmatmul.mubr.f32.gmra.mrb[52].mxu1 %v690_v53  ;;  %1451 = vmatprep.mubr.f32.mxu0 %v695_v54 }
 0x1c2   : > { %1965 = vmatprep.mubr.f32.mxu1 %v695_v54 }
 0x1c4   : > { %1452 = vmatmul.mubr.f32.gmra.mrb[54].mxu0 %v694_v55 }
 0x1c5   : > { %1966 = vmatmul.mubr.f32.gmra.mrb[54].mxu1 %v694_v55  ;;  %1457 = vmatprep.mubr.f32.mxu0 %v699_v56 }
 0x1c6   : > { %1971 = vmatprep.mubr.f32.mxu1 %v699_v56 }
 0x1c8   : > { %1458 = vmatmul.mubr.f32.gmra.mrb[56].mxu0 %v698_v57 }
 0x1c9   : > { %1972 = vmatmul.mubr.f32.gmra.mrb[56].mxu1 %v698_v57  ;;  %1463 = vmatprep.mubr.f32.mxu0 %v703_v58 }
 0x1ca   : > { %1977 = vmatprep.mubr.f32.mxu1 %v703_v58 }
 0x1cc   : > { %1464 = vmatmul.mubr.f32.gmra.mrb[58].mxu0 %v702_v59 }
 0x1cd   : > { %1978 = vmatmul.mubr.f32.gmra.mrb[58].mxu1 %v702_v59  ;;  %1469 = vmatprep.mubr.f32.mxu0 %v707_v60 }
 0x1ce   : > { %1983 = vmatprep.mubr.f32.mxu1 %v707_v60 }
 0x1d0   : > { %1470 = vmatmul.mubr.f32.gmra.mrb[60].mxu0 %v706_v61 }
 0x1d1   : > { %1984 = vmatmul.mubr.f32.gmra.mrb[60].mxu1 %v706_v61  ;;  %1475 = vmatprep.mubr.f32.mxu0 %v711_v62 }
 0x1d2   : > { %1989 = vmatprep.mubr.f32.mxu1 %v711_v62 }
 0x1d4   : > { %1476 = vmatmul.mubr.f32.gmra.mrb[62].mxu0 %v710_v63 }
 0x1d5   : > { %1990 = vmatmul.mubr.f32.gmra.mrb[62].mxu1 %v710_v63 }
 0x22b   : > { %v1291_v11 = vpop.f32.mrb[0].mxu0 }
 0x22c   : > { %v1996_v12 = vadd.f32 %v1291_v11, %v4193_v7  ;;  %v1805_v13 = vpop.f32.mrb[0].mxu1  ;;  %v1293_v14 = vpop.f32.mrb[1].mxu0 }
 0x22d   : > { %v1998_v15 = vadd.f32 %v1805_v13, %v4195_v8  ;;  %v1997_v16 = vadd.f32 %v1293_v14, %v4197_v9  ;;  %v1807_v17 = vpop.f32.mrb[1].mxu1 }
 0x22e   : > { %2383 = vst [vmem:[%s4204_s6] sm:$0xff] %v1996_v12  ;;  %v1999_v18 = vadd.f32 %v1807_v17, %v4199_v10 }
 0x22f   : > { %2385 = vst [vmem:[%s4204_s6 + $0x10] sm:$0xff] %v1998_v15  ;;  %2384 = vst [vmem:[%s4204_s6 + $0x8] sm:$0xff] %v1997_v16  ;;  %v1297_v19 = vpop.f32.mrb[2].mxu0 }
 0x230   : > { %2386 = vst [vmem:[%s4204_s6 + $0x18] sm:$0xff] %v1999_v18  ;;  %v2000_v20 = vadd.f32 %v1297_v19, %v4193_v7  ;;  %v1811_v21 = vpop.f32.mrb[2].mxu1  ;;  %v1299_v22 = vpop.f32.mrb[3].mxu0 }
 0x231   : > { %v2002_v23 = vadd.f32 %v1811_v21, %v4195_v8  ;;  %v2001_v24 = vadd.f32 %v1299_v22, %v4197_v9  ;;  %v1813_v25 = vpop.f32.mrb[3].mxu1 }
 0x232   : > { %2387 = vst [vmem:[%s4204_s6 + $0x20] sm:$0xff] %v2000_v20  ;;  %v2003_v26 = vadd.f32 %v1813_v25, %v4199_v10 }
 0x233   : > { %2389 = vst [vmem:[%s4204_s6 + $0x30] sm:$0xff] %v2002_v23  ;;  %2388 = vst [vmem:[%s4204_s6 + $0x28] sm:$0xff] %v2001_v24  ;;  %v1303_v27 = vpop.f32.mrb[4].mxu0 }
 0x234   : > { %2390 = vst [vmem:[%s4204_s6 + $0x38] sm:$0xff] %v2003_v26  ;;  %v2004_v28 = vadd.f32 %v1303_v27, %v4193_v7  ;;  %v1817_v29 = vpop.f32.mrb[4].mxu1  ;;  %v1305_v30 = vpop.f32.mrb[5].mxu0 }
 0x235   : > { %v2006_v31 = vadd.f32 %v1817_v29, %v4195_v8  ;;  %v2005_v32 = vadd.f32 %v1305_v30, %v4197_v9  ;;  %v1819_v33 = vpop.f32.mrb[5].mxu1 }
 0x236   : > { %2391 = vst [vmem:[%s4204_s6 + $0x40] sm:$0xff] %v2004_v28  ;;  %v2007_v34 = vadd.f32 %v1819_v33, %v4199_v10 }
 0x237   : > { %2393 = vst [vmem:[%s4204_s6 + $0x50] sm:$0xff] %v2006_v31  ;;  %2392 = vst [vmem:[%s4204_s6 + $0x48] sm:$0xff] %v2005_v32  ;;  %v1309_v35 = vpop.f32.mrb[6].mxu0 }
 0x238   : > { %2394 = vst [vmem:[%s4204_s6 + $0x58] sm:$0xff] %v2007_v34  ;;  %v2008_v36 = vadd.f32 %v1309_v35, %v4193_v7  ;;  %v1823_v37 = vpop.f32.mrb[6].mxu1  ;;  %v1311_v38 = vpop.f32.mrb[7].mxu0 }
 0x239   : > { %v2010_v39 = vadd.f32 %v1823_v37, %v4195_v8  ;;  %v2009_v40 = vadd.f32 %v1311_v38, %v4197_v9  ;;  %v1825_v41 = vpop.f32.mrb[7].mxu1 }
 0x23a   : > { %2395 = vst [vmem:[%s4204_s6 + $0x60] sm:$0xff] %v2008_v36  ;;  %v2011_v42 = vadd.f32 %v1825_v41, %v4199_v10 }
 0x23b   : > { %2397 = vst [vmem:[%s4204_s6 + $0x70] sm:$0xff] %v2010_v39  ;;  %2396 = vst [vmem:[%s4204_s6 + $0x68] sm:$0xff] %v2009_v40  ;;  %v1315_v43 = vpop.f32.mrb[8].mxu0 }
 0x23c   : > { %2398 = vst [vmem:[%s4204_s6 + $0x78] sm:$0xff] %v2011_v42  ;;  %v2012_v44 = vadd.f32 %v1315_v43, %v4193_v7  ;;  %v1829_v45 = vpop.f32.mrb[8].mxu1  ;;  %v1317_v46 = vpop.f32.mrb[9].mxu0 }
 0x23d   : > { %v2014_v47 = vadd.f32 %v1829_v45, %v4195_v8  ;;  %v2013_v48 = vadd.f32 %v1317_v46, %v4197_v9  ;;  %v1831_v49 = vpop.f32.mrb[9].mxu1 }
 0x23e   : > { %2399 = vst [vmem:[%s4204_s6 + $0x80] sm:$0xff] %v2012_v44  ;;  %v2015_v50 = vadd.f32 %v1831_v49, %v4199_v10 }
 0x23f   : > { %2401 = vst [vmem:[%s4204_s6 + $0x90] sm:$0xff] %v2014_v47  ;;  %2400 = vst [vmem:[%s4204_s6 + $0x88] sm:$0xff] %v2013_v48  ;;  %v1321_v51 = vpop.f32.mrb[10].mxu0 }
 0x240   : > { %2402 = vst [vmem:[%s4204_s6 + $0x98] sm:$0xff] %v2015_v50  ;;  %v2016_v52 = vadd.f32 %v1321_v51, %v4193_v7  ;;  %v1835_v53 = vpop.f32.mrb[10].mxu1  ;;  %v1323_v54 = vpop.f32.mrb[11].mxu0 }
 0x241   : > { %v2018_v55 = vadd.f32 %v1835_v53, %v4195_v8  ;;  %v2017_v56 = vadd.f32 %v1323_v54, %v4197_v9  ;;  %v1837_v57 = vpop.f32.mrb[11].mxu1 }
 0x242   : > { %2403 = vst [vmem:[%s4204_s6 + $0xa0] sm:$0xff] %v2016_v52  ;;  %v2019_v58 = vadd.f32 %v1837_v57, %v4199_v10 }
 0x243   : > { %2405 = vst [vmem:[%s4204_s6 + $0xb0] sm:$0xff] %v2018_v55  ;;  %2404 = vst [vmem:[%s4204_s6 + $0xa8] sm:$0xff] %v2017_v56  ;;  %v1327_v59 = vpop.f32.mrb[12].mxu0 }
 0x244   : > { %2406 = vst [vmem:[%s4204_s6 + $0xb8] sm:$0xff] %v2019_v58  ;;  %v2020_v60 = vadd.f32 %v1327_v59, %v4193_v7  ;;  %v1841_v61 = vpop.f32.mrb[12].mxu1  ;;  %v1329_v62 = vpop.f32.mrb[13].mxu0 }
 0x245   : > { %v2022_v63 = vadd.f32 %v1841_v61, %v4195_v8  ;;  %v2021_v0 = vadd.f32 %v1329_v62, %v4197_v9  ;;  %v1843_v1 = vpop.f32.mrb[13].mxu1 }
 0x246   : > { %2407 = vst [vmem:[%s4204_s6 + $0xc0] sm:$0xff] %v2020_v60  ;;  %v2023_v2 = vadd.f32 %v1843_v1, %v4199_v10 }
 0x247   : > { %2409 = vst [vmem:[%s4204_s6 + $0xd0] sm:$0xff] %v2022_v63  ;;  %2408 = vst [vmem:[%s4204_s6 + $0xc8] sm:$0xff] %v2021_v0  ;;  %v1333_v3 = vpop.f32.mrb[14].mxu0 }
 0x248   : > { %2410 = vst [vmem:[%s4204_s6 + $0xd8] sm:$0xff] %v2023_v2  ;;  %v2024_v4 = vadd.f32 %v1333_v3, %v4193_v7  ;;  %v1847_v5 = vpop.f32.mrb[14].mxu1  ;;  %v1335_v6 = vpop.f32.mrb[15].mxu0 }
 0x249   : > { %v2026_v11 = vadd.f32 %v1847_v5, %v4195_v8  ;;  %v2025_v12 = vadd.f32 %v1335_v6, %v4197_v9  ;;  %v1849_v13 = vpop.f32.mrb[15].mxu1 }
 0x24a   : > { %2411 = vst [vmem:[%s4204_s6 + $0xe0] sm:$0xff] %v2024_v4  ;;  %v2027_v14 = vadd.f32 %v1849_v13, %v4199_v10 }
 0x24b   : > { %2413 = vst [vmem:[%s4204_s6 + $0xf0] sm:$0xff] %v2026_v11  ;;  %2412 = vst [vmem:[%s4204_s6 + $0xe8] sm:$0xff] %v2025_v12  ;;  %v1339_v15 = vpop.f32.mrb[16].mxu0 }
 0x24c   : > { %2414 = vst [vmem:[%s4204_s6 + $0xf8] sm:$0xff] %v2027_v14  ;;  %v2028_v16 = vadd.f32 %v1339_v15, %v4193_v7  ;;  %v1853_v17 = vpop.f32.mrb[16].mxu1  ;;  %v1341_v18 = vpop.f32.mrb[17].mxu0 }
 0x24d   : > { %v2030_v19 = vadd.f32 %v1853_v17, %v4195_v8  ;;  %v2029_v20 = vadd.f32 %v1341_v18, %v4197_v9  ;;  %v1855_v21 = vpop.f32.mrb[17].mxu1 }
 0x24e   : > { %2415 = vst [vmem:[%s4204_s6 + $0x100] sm:$0xff] %v2028_v16  ;;  %v2031_v22 = vadd.f32 %v1855_v21, %v4199_v10 }
 0x24f   : > { %2417 = vst [vmem:[%s4204_s6 + $0x110] sm:$0xff] %v2030_v19  ;;  %2416 = vst [vmem:[%s4204_s6 + $0x108] sm:$0xff] %v2029_v20  ;;  %v1345_v23 = vpop.f32.mrb[18].mxu0 }
 0x250   : > { %2418 = vst [vmem:[%s4204_s6 + $0x118] sm:$0xff] %v2031_v22  ;;  %v2032_v24 = vadd.f32 %v1345_v23, %v4193_v7  ;;  %v1859_v25 = vpop.f32.mrb[18].mxu1  ;;  %v1347_v26 = vpop.f32.mrb[19].mxu0 }
 0x251   : > { %v2034_v27 = vadd.f32 %v1859_v25, %v4195_v8  ;;  %v2033_v28 = vadd.f32 %v1347_v26, %v4197_v9  ;;  %v1861_v29 = vpop.f32.mrb[19].mxu1 }
 0x252   : > { %2419 = vst [vmem:[%s4204_s6 + $0x120] sm:$0xff] %v2032_v24  ;;  %v2035_v30 = vadd.f32 %v1861_v29, %v4199_v10 }
 0x253   : > { %2421 = vst [vmem:[%s4204_s6 + $0x130] sm:$0xff] %v2034_v27  ;;  %2420 = vst [vmem:[%s4204_s6 + $0x128] sm:$0xff] %v2033_v28  ;;  %v1351_v31 = vpop.f32.mrb[20].mxu0 }
 0x254   : > { %2422 = vst [vmem:[%s4204_s6 + $0x138] sm:$0xff] %v2035_v30  ;;  %v2036_v32 = vadd.f32 %v1351_v31, %v4193_v7  ;;  %v1865_v33 = vpop.f32.mrb[20].mxu1  ;;  %v1353_v34 = vpop.f32.mrb[21].mxu0 }
 0x255   : > { %v2038_v35 = vadd.f32 %v1865_v33, %v4195_v8  ;;  %v2037_v36 = vadd.f32 %v1353_v34, %v4197_v9  ;;  %v1867_v37 = vpop.f32.mrb[21].mxu1 }
 0x256   : > { %2423 = vst [vmem:[%s4204_s6 + $0x140] sm:$0xff] %v2036_v32  ;;  %v2039_v38 = vadd.f32 %v1867_v37, %v4199_v10 }
 0x257   : > { %2425 = vst [vmem:[%s4204_s6 + $0x150] sm:$0xff] %v2038_v35  ;;  %2424 = vst [vmem:[%s4204_s6 + $0x148] sm:$0xff] %v2037_v36  ;;  %v1357_v39 = vpop.f32.mrb[22].mxu0 }
 0x258   : > { %2426 = vst [vmem:[%s4204_s6 + $0x158] sm:$0xff] %v2039_v38  ;;  %v2040_v40 = vadd.f32 %v1357_v39, %v4193_v7  ;;  %v1871_v41 = vpop.f32.mrb[22].mxu1  ;;  %v1359_v42 = vpop.f32.mrb[23].mxu0 }
 0x259   : > { %v2042_v43 = vadd.f32 %v1871_v41, %v4195_v8  ;;  %v2041_v44 = vadd.f32 %v1359_v42, %v4197_v9  ;;  %v1873_v45 = vpop.f32.mrb[23].mxu1 }
 0x25a   : > { %2427 = vst [vmem:[%s4204_s6 + $0x160] sm:$0xff] %v2040_v40  ;;  %v2043_v46 = vadd.f32 %v1873_v45, %v4199_v10 }
 0x25b   : > { %2429 = vst [vmem:[%s4204_s6 + $0x170] sm:$0xff] %v2042_v43  ;;  %2428 = vst [vmem:[%s4204_s6 + $0x168] sm:$0xff] %v2041_v44  ;;  %v1363_v47 = vpop.f32.mrb[24].mxu0 }
 0x25c   : > { %2430 = vst [vmem:[%s4204_s6 + $0x178] sm:$0xff] %v2043_v46  ;;  %v2044_v48 = vadd.f32 %v1363_v47, %v4193_v7  ;;  %v1877_v49 = vpop.f32.mrb[24].mxu1  ;;  %v1365_v50 = vpop.f32.mrb[25].mxu0 }
 0x25d   : > { %v2046_v51 = vadd.f32 %v1877_v49, %v4195_v8  ;;  %v2045_v52 = vadd.f32 %v1365_v50, %v4197_v9  ;;  %v1879_v53 = vpop.f32.mrb[25].mxu1 }
 0x25e   : > { %2431 = vst [vmem:[%s4204_s6 + $0x180] sm:$0xff] %v2044_v48  ;;  %v2047_v54 = vadd.f32 %v1879_v53, %v4199_v10 }
 0x25f   : > { %2433 = vst [vmem:[%s4204_s6 + $0x190] sm:$0xff] %v2046_v51  ;;  %2432 = vst [vmem:[%s4204_s6 + $0x188] sm:$0xff] %v2045_v52  ;;  %v1369_v55 = vpop.f32.mrb[26].mxu0 }
 0x260   : > { %2434 = vst [vmem:[%s4204_s6 + $0x198] sm:$0xff] %v2047_v54  ;;  %v2048_v56 = vadd.f32 %v1369_v55, %v4193_v7  ;;  %v1883_v57 = vpop.f32.mrb[26].mxu1  ;;  %v1371_v58 = vpop.f32.mrb[27].mxu0 }
 0x261   : > { %v2050_v59 = vadd.f32 %v1883_v57, %v4195_v8  ;;  %v2049_v60 = vadd.f32 %v1371_v58, %v4197_v9  ;;  %v1885_v61 = vpop.f32.mrb[27].mxu1 }
 0x262   : > { %2435 = vst [vmem:[%s4204_s6 + $0x1a0] sm:$0xff] %v2048_v56  ;;  %v2051_v62 = vadd.f32 %v1885_v61, %v4199_v10 }
 0x263   : > { %2437 = vst [vmem:[%s4204_s6 + $0x1b0] sm:$0xff] %v2050_v59  ;;  %2436 = vst [vmem:[%s4204_s6 + $0x1a8] sm:$0xff] %v2049_v60  ;;  %v1375_v63 = vpop.f32.mrb[28].mxu0 }
 0x264   : > { %2438 = vst [vmem:[%s4204_s6 + $0x1b8] sm:$0xff] %v2051_v62  ;;  %v2052_v0 = vadd.f32 %v1375_v63, %v4193_v7  ;;  %v1889_v1 = vpop.f32.mrb[28].mxu1  ;;  %v1377_v2 = vpop.f32.mrb[29].mxu0 }
 0x265   : > { %v2054_v3 = vadd.f32 %v1889_v1, %v4195_v8  ;;  %v2053_v4 = vadd.f32 %v1377_v2, %v4197_v9  ;;  %v1891_v5 = vpop.f32.mrb[29].mxu1 }
 0x266   : > { %2439 = vst [vmem:[%s4204_s6 + $0x1c0] sm:$0xff] %v2052_v0  ;;  %v2055_v6 = vadd.f32 %v1891_v5, %v4199_v10 }
 0x267   : > { %2441 = vst [vmem:[%s4204_s6 + $0x1d0] sm:$0xff] %v2054_v3  ;;  %2440 = vst [vmem:[%s4204_s6 + $0x1c8] sm:$0xff] %v2053_v4  ;;  %v1381_v11 = vpop.f32.mrb[30].mxu0 }
 0x268   : > { %2442 = vst [vmem:[%s4204_s6 + $0x1d8] sm:$0xff] %v2055_v6  ;;  %v2056_v12 = vadd.f32 %v1381_v11, %v4193_v7  ;;  %v1895_v13 = vpop.f32.mrb[30].mxu1  ;;  %v1383_v14 = vpop.f32.mrb[31].mxu0 }
 0x269   : > { %v2058_v15 = vadd.f32 %v1895_v13, %v4195_v8  ;;  %v2057_v16 = vadd.f32 %v1383_v14, %v4197_v9  ;;  %v1897_v17 = vpop.f32.mrb[31].mxu1 }
 0x26a   : > { %2443 = vst [vmem:[%s4204_s6 + $0x1e0] sm:$0xff] %v2056_v12  ;;  %v2059_v18 = vadd.f32 %v1897_v17, %v4199_v10 }
 0x26b   : > { %2445 = vst [vmem:[%s4204_s6 + $0x1f0] sm:$0xff] %v2058_v15  ;;  %2444 = vst [vmem:[%s4204_s6 + $0x1e8] sm:$0xff] %v2057_v16  ;;  %v1387_v19 = vpop.f32.mrb[32].mxu0 }
 0x26c   : > { %2446 = vst [vmem:[%s4204_s6 + $0x1f8] sm:$0xff] %v2059_v18  ;;  %v2060_v20 = vadd.f32 %v1387_v19, %v4193_v7  ;;  %v1901_v21 = vpop.f32.mrb[32].mxu1  ;;  %v1389_v22 = vpop.f32.mrb[33].mxu0 }
 0x26d   : > { %v2062_v23 = vadd.f32 %v1901_v21, %v4195_v8  ;;  %v2061_v24 = vadd.f32 %v1389_v22, %v4197_v9  ;;  %v1903_v25 = vpop.f32.mrb[33].mxu1 }
 0x26e   : > { %2447 = vst [vmem:[%s4204_s6 + $0x200] sm:$0xff] %v2060_v20  ;;  %v2063_v26 = vadd.f32 %v1903_v25, %v4199_v10 }
 0x26f   : > { %2449 = vst [vmem:[%s4204_s6 + $0x210] sm:$0xff] %v2062_v23  ;;  %2448 = vst [vmem:[%s4204_s6 + $0x208] sm:$0xff] %v2061_v24  ;;  %v1393_v27 = vpop.f32.mrb[34].mxu0 }
 0x270   : > { %2450 = vst [vmem:[%s4204_s6 + $0x218] sm:$0xff] %v2063_v26  ;;  %v2064_v28 = vadd.f32 %v1393_v27, %v4193_v7  ;;  %v1907_v29 = vpop.f32.mrb[34].mxu1  ;;  %v1395_v30 = vpop.f32.mrb[35].mxu0 }
 0x271   : > { %v2066_v31 = vadd.f32 %v1907_v29, %v4195_v8  ;;  %v2065_v32 = vadd.f32 %v1395_v30, %v4197_v9  ;;  %v1909_v33 = vpop.f32.mrb[35].mxu1 }
 0x272   : > { %2451 = vst [vmem:[%s4204_s6 + $0x220] sm:$0xff] %v2064_v28  ;;  %v2067_v34 = vadd.f32 %v1909_v33, %v4199_v10 }
 0x273   : > { %2453 = vst [vmem:[%s4204_s6 + $0x230] sm:$0xff] %v2066_v31  ;;  %2452 = vst [vmem:[%s4204_s6 + $0x228] sm:$0xff] %v2065_v32  ;;  %v1399_v35 = vpop.f32.mrb[36].mxu0 }
 0x274   : > { %2454 = vst [vmem:[%s4204_s6 + $0x238] sm:$0xff] %v2067_v34  ;;  %v2068_v36 = vadd.f32 %v1399_v35, %v4193_v7  ;;  %v1913_v37 = vpop.f32.mrb[36].mxu1  ;;  %v1401_v38 = vpop.f32.mrb[37].mxu0 }
 0x275   : > { %v2070_v39 = vadd.f32 %v1913_v37, %v4195_v8  ;;  %v2069_v40 = vadd.f32 %v1401_v38, %v4197_v9  ;;  %v1915_v41 = vpop.f32.mrb[37].mxu1 }
 0x276   : > { %2455 = vst [vmem:[%s4204_s6 + $0x240] sm:$0xff] %v2068_v36  ;;  %v2071_v42 = vadd.f32 %v1915_v41, %v4199_v10 }
 0x277   : > { %2457 = vst [vmem:[%s4204_s6 + $0x250] sm:$0xff] %v2070_v39  ;;  %2456 = vst [vmem:[%s4204_s6 + $0x248] sm:$0xff] %v2069_v40  ;;  %v1405_v43 = vpop.f32.mrb[38].mxu0 }
 0x278   : > { %2458 = vst [vmem:[%s4204_s6 + $0x258] sm:$0xff] %v2071_v42  ;;  %v2072_v44 = vadd.f32 %v1405_v43, %v4193_v7  ;;  %v1919_v45 = vpop.f32.mrb[38].mxu1  ;;  %v1407_v46 = vpop.f32.mrb[39].mxu0 }
 0x279   : > { %v2074_v47 = vadd.f32 %v1919_v45, %v4195_v8  ;;  %v2073_v48 = vadd.f32 %v1407_v46, %v4197_v9  ;;  %v1921_v49 = vpop.f32.mrb[39].mxu1 }
 0x27a   : > { %2459 = vst [vmem:[%s4204_s6 + $0x260] sm:$0xff] %v2072_v44  ;;  %v2075_v50 = vadd.f32 %v1921_v49, %v4199_v10 }
 0x27b   : > { %2461 = vst [vmem:[%s4204_s6 + $0x270] sm:$0xff] %v2074_v47  ;;  %2460 = vst [vmem:[%s4204_s6 + $0x268] sm:$0xff] %v2073_v48  ;;  %v1411_v51 = vpop.f32.mrb[40].mxu0 }
 0x27c   : > { %2462 = vst [vmem:[%s4204_s6 + $0x278] sm:$0xff] %v2075_v50  ;;  %v2076_v52 = vadd.f32 %v1411_v51, %v4193_v7  ;;  %v1925_v53 = vpop.f32.mrb[40].mxu1  ;;  %v1413_v54 = vpop.f32.mrb[41].mxu0 }
 0x27d   : > { %v2078_v55 = vadd.f32 %v1925_v53, %v4195_v8  ;;  %v2077_v56 = vadd.f32 %v1413_v54, %v4197_v9  ;;  %v1927_v57 = vpop.f32.mrb[41].mxu1 }
 0x27e   : > { %2463 = vst [vmem:[%s4204_s6 + $0x280] sm:$0xff] %v2076_v52  ;;  %v2079_v58 = vadd.f32 %v1927_v57, %v4199_v10 }
 0x27f   : > { %2465 = vst [vmem:[%s4204_s6 + $0x290] sm:$0xff] %v2078_v55  ;;  %2464 = vst [vmem:[%s4204_s6 + $0x288] sm:$0xff] %v2077_v56  ;;  %v1417_v59 = vpop.f32.mrb[42].mxu0 }
 0x280   : > { %2466 = vst [vmem:[%s4204_s6 + $0x298] sm:$0xff] %v2079_v58  ;;  %v2080_v60 = vadd.f32 %v1417_v59, %v4193_v7  ;;  %v1931_v61 = vpop.f32.mrb[42].mxu1  ;;  %v1419_v62 = vpop.f32.mrb[43].mxu0 }
 0x281   : > { %v2082_v63 = vadd.f32 %v1931_v61, %v4195_v8  ;;  %v2081_v0 = vadd.f32 %v1419_v62, %v4197_v9  ;;  %v1933_v1 = vpop.f32.mrb[43].mxu1 }
 0x282   : > { %2467 = vst [vmem:[%s4204_s6 + $0x2a0] sm:$0xff] %v2080_v60  ;;  %v2083_v2 = vadd.f32 %v1933_v1, %v4199_v10 }
 0x283   : > { %2469 = vst [vmem:[%s4204_s6 + $0x2b0] sm:$0xff] %v2082_v63  ;;  %2468 = vst [vmem:[%s4204_s6 + $0x2a8] sm:$0xff] %v2081_v0  ;;  %v1423_v3 = vpop.f32.mrb[44].mxu0 }
 0x284   : > { %2470 = vst [vmem:[%s4204_s6 + $0x2b8] sm:$0xff] %v2083_v2  ;;  %v2084_v4 = vadd.f32 %v1423_v3, %v4193_v7  ;;  %v1937_v5 = vpop.f32.mrb[44].mxu1  ;;  %v1425_v6 = vpop.f32.mrb[45].mxu0 }
 0x285   : > { %v2086_v11 = vadd.f32 %v1937_v5, %v4195_v8  ;;  %v2085_v12 = vadd.f32 %v1425_v6, %v4197_v9  ;;  %v1939_v13 = vpop.f32.mrb[45].mxu1 }
 0x286   : > { %2471 = vst [vmem:[%s4204_s6 + $0x2c0] sm:$0xff] %v2084_v4  ;;  %v2087_v14 = vadd.f32 %v1939_v13, %v4199_v10 }
 0x287   : > { %2473 = vst [vmem:[%s4204_s6 + $0x2d0] sm:$0xff] %v2086_v11  ;;  %2472 = vst [vmem:[%s4204_s6 + $0x2c8] sm:$0xff] %v2085_v12  ;;  %v1429_v15 = vpop.f32.mrb[46].mxu0 }
 0x288   : > { %2474 = vst [vmem:[%s4204_s6 + $0x2d8] sm:$0xff] %v2087_v14  ;;  %v2088_v16 = vadd.f32 %v1429_v15, %v4193_v7  ;;  %v1943_v17 = vpop.f32.mrb[46].mxu1  ;;  %v1431_v18 = vpop.f32.mrb[47].mxu0 }
 0x289   : > { %v2090_v19 = vadd.f32 %v1943_v17, %v4195_v8  ;;  %v2089_v20 = vadd.f32 %v1431_v18, %v4197_v9  ;;  %v1945_v21 = vpop.f32.mrb[47].mxu1 }
 0x28a   : > { %2475 = vst [vmem:[%s4204_s6 + $0x2e0] sm:$0xff] %v2088_v16  ;;  %v2091_v22 = vadd.f32 %v1945_v21, %v4199_v10 }
 0x28b   : > { %2477 = vst [vmem:[%s4204_s6 + $0x2f0] sm:$0xff] %v2090_v19  ;;  %2476 = vst [vmem:[%s4204_s6 + $0x2e8] sm:$0xff] %v2089_v20  ;;  %v1435_v23 = vpop.f32.mrb[48].mxu0 }
 0x28c   : > { %2478 = vst [vmem:[%s4204_s6 + $0x2f8] sm:$0xff] %v2091_v22  ;;  %v2092_v24 = vadd.f32 %v1435_v23, %v4193_v7  ;;  %v1949_v25 = vpop.f32.mrb[48].mxu1  ;;  %v1437_v26 = vpop.f32.mrb[49].mxu0 }
 0x28d   : > { %v2094_v27 = vadd.f32 %v1949_v25, %v4195_v8  ;;  %v2093_v28 = vadd.f32 %v1437_v26, %v4197_v9  ;;  %v1951_v29 = vpop.f32.mrb[49].mxu1 }
 0x28e   : > { %2479 = vst [vmem:[%s4204_s6 + $0x300] sm:$0xff] %v2092_v24  ;;  %v2095_v30 = vadd.f32 %v1951_v29, %v4199_v10 }
 0x28f   : > { %2481 = vst [vmem:[%s4204_s6 + $0x310] sm:$0xff] %v2094_v27  ;;  %2480 = vst [vmem:[%s4204_s6 + $0x308] sm:$0xff] %v2093_v28  ;;  %v1441_v31 = vpop.f32.mrb[50].mxu0 }
 0x290   : > { %2482 = vst [vmem:[%s4204_s6 + $0x318] sm:$0xff] %v2095_v30  ;;  %v2096_v32 = vadd.f32 %v1441_v31, %v4193_v7  ;;  %v1955_v33 = vpop.f32.mrb[50].mxu1  ;;  %v1443_v34 = vpop.f32.mrb[51].mxu0 }
 0x291   : > { %v2098_v35 = vadd.f32 %v1955_v33, %v4195_v8  ;;  %v2097_v36 = vadd.f32 %v1443_v34, %v4197_v9  ;;  %v1957_v37 = vpop.f32.mrb[51].mxu1 }
 0x292   : > { %2483 = vst [vmem:[%s4204_s6 + $0x320] sm:$0xff] %v2096_v32  ;;  %v2099_v38 = vadd.f32 %v1957_v37, %v4199_v10 }
 0x293   : > { %2485 = vst [vmem:[%s4204_s6 + $0x330] sm:$0xff] %v2098_v35  ;;  %2484 = vst [vmem:[%s4204_s6 + $0x328] sm:$0xff] %v2097_v36  ;;  %v1447_v39 = vpop.f32.mrb[52].mxu0 }
 0x294   : > { %2486 = vst [vmem:[%s4204_s6 + $0x338] sm:$0xff] %v2099_v38  ;;  %v2100_v40 = vadd.f32 %v1447_v39, %v4193_v7  ;;  %v1961_v41 = vpop.f32.mrb[52].mxu1  ;;  %v1449_v42 = vpop.f32.mrb[53].mxu0 }
 0x295   : > { %v2102_v43 = vadd.f32 %v1961_v41, %v4195_v8  ;;  %v2101_v44 = vadd.f32 %v1449_v42, %v4197_v9  ;;  %v1963_v45 = vpop.f32.mrb[53].mxu1 }
 0x296   : > { %2487 = vst [vmem:[%s4204_s6 + $0x340] sm:$0xff] %v2100_v40  ;;  %v2103_v46 = vadd.f32 %v1963_v45, %v4199_v10 }
 0x297   : > { %2489 = vst [vmem:[%s4204_s6 + $0x350] sm:$0xff] %v2102_v43  ;;  %2488 = vst [vmem:[%s4204_s6 + $0x348] sm:$0xff] %v2101_v44  ;;  %v1453_v47 = vpop.f32.mrb[54].mxu0 }
 0x298   : > { %2490 = vst [vmem:[%s4204_s6 + $0x358] sm:$0xff] %v2103_v46  ;;  %v2104_v48 = vadd.f32 %v1453_v47, %v4193_v7  ;;  %v1967_v49 = vpop.f32.mrb[54].mxu1  ;;  %v1455_v50 = vpop.f32.mrb[55].mxu0 }
 0x299   : > { %v2106_v51 = vadd.f32 %v1967_v49, %v4195_v8  ;;  %v2105_v52 = vadd.f32 %v1455_v50, %v4197_v9  ;;  %v1969_v53 = vpop.f32.mrb[55].mxu1 }
 0x29a   : > { %2491 = vst [vmem:[%s4204_s6 + $0x360] sm:$0xff] %v2104_v48  ;;  %v2107_v54 = vadd.f32 %v1969_v53, %v4199_v10 }
 0x29b   : > { %2493 = vst [vmem:[%s4204_s6 + $0x370] sm:$0xff] %v2106_v51  ;;  %2492 = vst [vmem:[%s4204_s6 + $0x368] sm:$0xff] %v2105_v52  ;;  %v1459_v55 = vpop.f32.mrb[56].mxu0 }
 0x29c   : > { %2494 = vst [vmem:[%s4204_s6 + $0x378] sm:$0xff] %v2107_v54  ;;  %v2108_v56 = vadd.f32 %v1459_v55, %v4193_v7  ;;  %v1973_v57 = vpop.f32.mrb[56].mxu1  ;;  %v1461_v58 = vpop.f32.mrb[57].mxu0 }
 0x29d   : > { %v2110_v59 = vadd.f32 %v1973_v57, %v4195_v8  ;;  %v2109_v60 = vadd.f32 %v1461_v58, %v4197_v9  ;;  %v1975_v61 = vpop.f32.mrb[57].mxu1 }
 0x29e   : > { %2495 = vst [vmem:[%s4204_s6 + $0x380] sm:$0xff] %v2108_v56  ;;  %v2111_v62 = vadd.f32 %v1975_v61, %v4199_v10 }
 0x29f   : > { %2497 = vst [vmem:[%s4204_s6 + $0x390] sm:$0xff] %v2110_v59  ;;  %2496 = vst [vmem:[%s4204_s6 + $0x388] sm:$0xff] %v2109_v60  ;;  %v1465_v63 = vpop.f32.mrb[58].mxu0 }
 0x2a0   : > { %2498 = vst [vmem:[%s4204_s6 + $0x398] sm:$0xff] %v2111_v62  ;;  %v2112_v0 = vadd.f32 %v1465_v63, %v4193_v7  ;;  %v1979_v1 = vpop.f32.mrb[58].mxu1  ;;  %v1467_v2 = vpop.f32.mrb[59].mxu0 }
 0x2a1   : > { %v2114_v3 = vadd.f32 %v1979_v1, %v4195_v8  ;;  %v2113_v4 = vadd.f32 %v1467_v2, %v4197_v9  ;;  %v1981_v5 = vpop.f32.mrb[59].mxu1 }
 0x2a2   : > { %2499 = vst [vmem:[%s4204_s6 + $0x3a0] sm:$0xff] %v2112_v0  ;;  %v2115_v6 = vadd.f32 %v1981_v5, %v4199_v10 }
 0x2a3   : > { %2501 = vst [vmem:[%s4204_s6 + $0x3b0] sm:$0xff] %v2114_v3  ;;  %2500 = vst [vmem:[%s4204_s6 + $0x3a8] sm:$0xff] %v2113_v4  ;;  %v1471_v11 = vpop.f32.mrb[60].mxu0 }
 0x2a4   : > { %2502 = vst [vmem:[%s4204_s6 + $0x3b8] sm:$0xff] %v2115_v6  ;;  %v2116_v12 = vadd.f32 %v1471_v11, %v4193_v7  ;;  %v1985_v13 = vpop.f32.mrb[60].mxu1  ;;  %v1473_v14 = vpop.f32.mrb[61].mxu0 }
 0x2a5   : > { %v2118_v15 = vadd.f32 %v1985_v13, %v4195_v8  ;;  %v2117_v16 = vadd.f32 %v1473_v14, %v4197_v9  ;;  %v1987_v17 = vpop.f32.mrb[61].mxu1 }
 0x2a6   : > { %2503 = vst [vmem:[%s4204_s6 + $0x3c0] sm:$0xff] %v2116_v12  ;;  %v2119_v18 = vadd.f32 %v1987_v17, %v4199_v10 }
 0x2a7   : > { %2505 = vst [vmem:[%s4204_s6 + $0x3d0] sm:$0xff] %v2118_v15  ;;  %2504 = vst [vmem:[%s4204_s6 + $0x3c8] sm:$0xff] %v2117_v16  ;;  %v1477_v19 = vpop.f32.mrb[62].mxu0 }
 0x2a8   : > { %2506 = vst [vmem:[%s4204_s6 + $0x3d8] sm:$0xff] %v2119_v18  ;;  %v2120_v20 = vadd.f32 %v1477_v19, %v4193_v7  ;;  %v1991_v21 = vpop.f32.mrb[62].mxu1  ;;  %v1479_v22 = vpop.f32.mrb[63].mxu0 }
 0x2a9   : > { %v2122_v23 = vadd.f32 %v1991_v21, %v4195_v8  ;;  %v2121_v24 = vadd.f32 %v1479_v22, %v4197_v9  ;;  %v1993_v25 = vpop.f32.mrb[63].mxu1 }
 0x2aa   : > { %2507 = vst [vmem:[%s4204_s6 + $0x3e0] sm:$0xff] %v2120_v20  ;;  %v2123_v7 = vadd.f32 %v1993_v25, %v4199_v10 }
 0x2ab   : > { %2509 = vst [vmem:[%s4204_s6 + $0x3f0] sm:$0xff] %v2122_v23  ;;  %2508 = vst [vmem:[%s4204_s6 + $0x3e8] sm:$0xff] %v2121_v24 }
 0x2ac   : > { %2510 = vst [vmem:[%s4204_s6 + $0x3f8] sm:$0xff] %v2123_v7 }
 0x2ad   : > { %3327 = shalt.err (!%p3324_p1)
}
 0x2ae   : > { %s3328_s7 = scalar_lea.hbm %s4458_s15, 16384  ;;  %s3332_s10 = scalar_lea.hbm %s4608_s26, 98304 }
 0x2af   : > { %p3329_p0 = scmp.ne.s32.totalorder %s4458_s15, %s3328_s7  ;;  %p3333_p8 = scmp.lt.u32.totalorder %s4458_s15, %s4608_s26 }
 0x2b0   : > { %p3334_p10 = scmp.lt.u32.totalorder %s3332_s10, %s3328_s7  ;;  %p3336_p7 = scmp.lt.u32.totalorder %s3328_s7, %s4458_s15 }
 0x2b1   : > { %p3330_p12 = pnand %p3329_p0, %p4609_p11 }
 0x2b2   : > { %p3335_p6 = por %p3334_p10, %p3333_p8 }
 0x2b3   : > { %p3331_p13 = pneg %p3330_p12 }
 0x2b4   : > { %p3337_p5 = por %p3336_p7, %p3335_p6 }
 0x2b6   : > { %p3338_p2 = pnand %p3337_p5, %p3331_p13 }
 0x2b8   : > { %3341 = shalt.err (!%p3338_p2)
}
 0x2b9   : > { %s3473_s1 = smov 512   ;;  %s3474_s17 = smov 1536  }
 0x2ba   : > { %s3475_s22 = smov 32  }
 0x2bb   : > { %3088 = dma.vmem_to_hbm [thread:$0]  (%p4609_p11), %s4462_s21, 16384, %s4458_s15, %s4471_s30, %s3473_s1, %s3474_s17, %s3475_s22  }
 0x2bc PF: > { %p3105_p3 = scmp.ge.s32.totalorder %s3464_s25, 2  ;;  %s2543_s3 = sand.u32 1, %s3412_s12  }
 0x2bd   : > { %p4610_p9 = scmp.ne.s32.totalorder %s4594_s8, 0  ;;  %s2544_s20 = scalar_lea.sflag [#allocation5], %s2543_s3 }
 0x2bf   : > { %p3101_p4 = pnand %p3105_p3, %p4610_p9 }
 0x2c1   : > { %3407 = dma.done.wait (!%p3101_p4), %s2544_s20, 16384  }
 0x2c2   : > { %3409 = vsyncadd (!%p3101_p4), %s2544_s20, 4294950912  ;;  %s22_s25 = sadd.s32 1, %s3464_s25   ;;  %s4612_s28 = sld [smem:[#allocation13_spill]] }
 0x2c3   : > { %p4500_p1 = scmp.ge.s32.totalorder %s22_s25, 8   ;;  %s4613_s14 = sld [smem:[#allocation24_spill]] }
 0x2c4   : > { %s4614_s21 = sld [smem:[#allocation14_spill]]  ;;  %s4615_s17 = sld [smem:[#allocation22_spill]] }
 0x2c5   : > { %s4616_s23 = sld [smem:[#allocation15_spill]]  ;;  %s4617_s20 = sld [smem:[#allocation23_spill]] }
 0x2c6   : > { %s4618_s8 = sld [smem:[#allocation18_spill]]  ;;  %s4619_s22 = sld [smem:[#allocation19_spill]] }
 0x2c7   : > { %s4620_s30 = sld [smem:[#allocation20_spill]]  ;;  %s4621_s24 = sld [smem:[#allocation21_spill]] }
 0x2c8   : > { %s4622_s12 = smov %s3416_s13  ;;  %s4623_s13 = smov %s4612_s28 }
 0x2c9   : > { %s4624_s15 = smov %s3428_s16  ;;  %s4626_s18 = smov %s3440_s19 }
 0x2ca   : > { %s4625_s16 = smov %s4614_s21  ;;  %21 = sbr.rel (!%p4500_p1) target bundleno = 15 (0xf), region = 109 }
 0x2cb   : > { %s4627_s19 = smov %s4616_s23 }
 0x2cc   : > { %s4628_s21 = smov %s4618_s8 }
 0x2cd   : > { %s4629_s23 = smov %s4620_s30 }
 0x2d1   :  { %2549 = vsyncpa [#allocation4], 1 }
 0x2d2   :  { %2551 = vsyncpa [#allocation4 + $0x1], 1 }
 0x2d3   :  { %2552 = vsyncpa [#allocation7], 1 }
 0x2d4   :  { %2554 = vsyncpa [#allocation7 + $0x1], 1 }
 0x2d5   :  { %2555 = vsyncpa [#allocation5], 1 }
 0x2d6   :  { %2557 = vsyncpa [#allocation5 + $0x1], 1 }

</bundles_post_ra>
